<compile_context>
chip_gen: v6e
topology: v6e:2x2x1
jax: 0.10.0
libtpu: 0.0.40
codegen_flags: <defaults>
</compile_context>

<pallas_src>
import math
import numpy as np
import jax
import jax.numpy as jnp
from jax import lax
from jax.experimental import pallas as pl
from jax.experimental.pallas import tpu as pltpu

LN_EPS = 1e-5                      # torch.nn.LayerNorm default
INV_SQRT2 = 1.0 / math.sqrt(2.0)


# ------------------------------- kernels --------------------------------------------------------

def ffn_resident_kernel(x_ref, w1_ref, b1_ref, w2_ref, b2_ref, o_ref):
    # x_ref: (tm, dim) f32 rows; w1/w2 full bf16 weights resident in VMEM; biases f32 (1, N).
    x = x_ref[...].astype(jnp.float32)

    # LayerNorm over last dim (biased variance, like torch).  gamma/beta are pre-folded into W1/b1.
    mu = jnp.mean(x, axis=-1, keepdims=True)
    xc = x - mu
    var = jnp.mean(xc * xc, axis=-1, keepdims=True)
    xn = xc * lax.rsqrt(var + LN_EPS)

    # Linear(dim -> out_dim): bf16 MXU inputs, f32 accumulation.
    h = jnp.dot(xn.astype(jnp.bfloat16), w1_ref[...],
                preferred_element_type=jnp.float32) + b1_ref[...]

    # GELU (exact erf, torch.nn.GELU default).  Dropout: identity in eval mode.
    h = 0.5 * h * (1.0 + lax.erf(h * INV_SQRT2))

    # Linear(out_dim -> out_dim).  Dropout: identity in eval mode.
    y = jnp.dot(h.astype(jnp.bfloat16), w2_ref[...],
                preferred_element_type=jnp.float32) + b2_ref[...]
    o_ref[...] = y.astype(o_ref.dtype)


def ffn_streamed_kernel(x_ref, w1_ref, b1_ref, w2_ref, b2_ref, o_ref, xn_ref, acc_ref):
    # Grid: (rows i, hidden-tile h).  W1 block (dim, th), W2 block (th, out_dim).
    hi = pl.program_id(1)

    @pl.when(hi == 0)
    def _():
        x = x_ref[...].astype(jnp.float32)
        mu = jnp.mean(x, axis=-1, keepdims=True)
        xc = x - mu
        var = jnp.mean(xc * xc, axis=-1, keepdims=True)
        xn_ref[...] = (xc * lax.rsqrt(var + LN_EPS)).astype(jnp.bfloat16)
        acc_ref[...] = jnp.zeros_like(acc_ref)

    h = jnp.dot(xn_ref[...], w1_ref[...],
                preferred_element_type=jnp.float32) + b1_ref[...]
    h = 0.5 * h * (1.0 + lax.erf(h * INV_SQRT2))
    acc_ref[...] += jnp.dot(h.astype(jnp.bfloat16), w2_ref[...],
                            preferred_element_type=jnp.float32)

    @pl.when(hi == pl.num_programs(1) - 1)
    def _():
        o_ref[...] = (acc_ref[...] + b2_ref[...]).astype(o_ref.dtype)


# ------------------------------- host-side wrappers ----------------------------------------------

def prepare_ffn_params(gamma, beta, w1, b1, w2, b2):
    """One-time (weight-load time) preprocessing — NOT part of the per-call hot path.

    Folds the LayerNorm affine into the first Linear (W1' = gamma[:,None]*W1,
    b1' = b1 + beta @ W1), casts weights to bf16 for the MXU and reshapes biases to
    lane-major (1, N).  w1: (dim, out_dim), w2: (out_dim, out_dim) — i.e. torch Linear
    weights must be transposed from (out, in) to (in, out) before calling this.
    """
    gamma = gamma.astype(jnp.float32)
    beta = beta.astype(jnp.float32)
    w1 = w1.astype(jnp.float32)
    w2 = w2.astype(jnp.float32)
    w1f = gamma[:, None] * w1
    b1f = b1.astype(jnp.float32) + beta @ w1
    return {
        "w1": w1f.astype(jnp.bfloat16),
        "b1": b1f.reshape(1, -1),
        "w2": w2.astype(jnp.bfloat16),
        "b2": b2.reshape(1, -1).astype(jnp.float32),
    }


def _vmem_budget(tm, dim, out_dim, th, streamed, x_itemsize, out_itemsize):
    """Actual VMEM need (tiles x buffer counts + scratch) with slack; avoids blanket-requesting
    the whole of v7x's 64 MiB while still unlocking big tiles on 128 MiB parts."""
    b = 2 * tm * dim * x_itemsize + 2 * tm * out_dim * out_itemsize      # x / out, double-buffered
    if streamed:
        b += 2 * (dim * th + th * out_dim) * 2 + 2 * th * 4              # W1/W2/b1 tiles (bf16/f32)
        b += out_dim * 4                                                 # b2 (Buffered(1))
        b += tm * dim * 2 + tm * out_dim * 4                             # xn bf16 + acc f32 scratch
    else:
        b += (dim * out_dim + out_dim * out_dim) * 2                     # resident bf16 W1/W2 (x1)
        b += 2 * out_dim * 4                                             # b1, b2
    return min(max(int(b * 1.5) + (4 << 20), 32 << 20), 100 << 20)


def _call_resident(x2, p, *, tm, out_dtype, vmem_limit_bytes):
    M, dim = x2.shape
    out_dim = p["w1"].shape[1]
    grid_m = M // tm

    def resident(shape):
        # Grid-invariant parameter block: fetched once, single-buffered (halves its VMEM cost).
        return pl.BlockSpec(shape, lambda i: (0, 0), pipeline_mode=pl.Buffered(1))

    return pl.pallas_call(
        ffn_resident_kernel,
        out_shape=jax.ShapeDtypeStruct((M, out_dim), out_dtype),
        grid_spec=pltpu.PrefetchScalarGridSpec(
            num_scalar_prefetch=0,
            grid=(grid_m,),
            in_specs=[
                pl.BlockSpec((tm, dim), lambda i: (i, 0)),   # x rows
                resident((dim, out_dim)),                    # W1 (in, out) bf16
                resident((1, out_dim)),                      # b1 (gamma/beta folded in)
                resident((out_dim, out_dim)),                # W2 bf16
                resident((1, out_dim)),                      # b2
            ],
            out_specs=pl.BlockSpec((tm, out_dim), lambda i: (i, 0)),
        ),
        compiler_params=pltpu.CompilerParams(
            dimension_semantics=("parallel",),               # shard row tiles across TCs (v7x)
            vmem_limit_bytes=vmem_limit_bytes),
    )(x2, p["w1"], p["b1"], p["w2"], p["b2"])


def _call_streamed(x2, p, *, tm, th, out_dtype, vmem_limit_bytes):
    M, dim = x2.shape
    out_dim = p["w1"].shape[1]
    grid_m = M // tm
    grid_h = out_dim // th

    return pl.pallas_call(
        ffn_streamed_kernel,
        out_shape=jax.ShapeDtypeStruct((M, out_dim), out_dtype),
        grid_spec=pltpu.PrefetchScalarGridSpec(
            num_scalar_prefetch=0,
            grid=(grid_m, grid_h),
            in_specs=[
                pl.BlockSpec((tm, dim), lambda i, h: (i, 0)),          # x rows (invariant in h)
                pl.BlockSpec((dim, th), lambda i, h: (0, h)),          # W1 hidden-tile
                pl.BlockSpec((1, th), lambda i, h: (0, h)),            # b1 hidden-tile
                pl.BlockSpec((th, out_dim), lambda i, h: (h, 0)),      # W2 hidden-tile
                pl.BlockSpec((1, out_dim), lambda i, h: (0, 0),
                             pipeline_mode=pl.Buffered(1)),            # b2 (grid-invariant)
            ],
            out_specs=pl.BlockSpec((tm, out_dim), lambda i, h: (i, 0)),
            scratch_shapes=[pltpu.VMEM((tm, dim), jnp.bfloat16),        # LN output, reused over h
                            pltpu.VMEM((tm, out_dim), jnp.float32)],    # matmul-2 accumulator
        ),
        compiler_params=pltpu.CompilerParams(
            dimension_semantics=("parallel", "arbitrary"),
            vmem_limit_bytes=vmem_limit_bytes),
    )(x2, p["w1"], p["b1"], p["w2"], p["b2"])


def feedforward_pallas(x, params, *, tm=256, th=None, out_dtype=None, vmem_limit_bytes=None):
    """x: (..., dim).  params: output of prepare_ffn_params.  Returns (..., out_dim).

    out_dtype=jnp.bfloat16 halves the output writeback traffic if downstream tolerates it.
    th (hidden-dim tile) is auto-picked: weights stay VMEM-resident when small enough,
    otherwise streamed in multiples of 256 (model-scale / v7x)."""
    orig_shape = x.shape
    dim = orig_shape[-1]
    out_dim = params["w1"].shape[1]
    out_dtype = np.dtype(x.dtype if out_dtype is None else out_dtype)

    x2 = x.reshape(-1, dim)
    M = x2.shape[0]

    if th is None:
        resident_bytes = (dim * out_dim + out_dim * out_dim) * 2       # bf16, Buffered(1)
        if resident_bytes <= 24 * 1024 * 1024:
            th = out_dim                                               # keep weights resident
        elif out_dim % 512 == 0:
            th = 512                                                   # feeds 2x256x256 MXU
        elif out_dim % 256 == 0:
            th = 256
        else:
            th = out_dim  # TODO(synk): ragged hidden-dim tiling for non-multiple-of-256 widths
    assert out_dim % th == 0, "hidden tile th must divide out_dim"
    streamed = th != out_dim

    def run(xr, tm_r):
        vmem = vmem_limit_bytes if vmem_limit_bytes is not None else _vmem_budget(
            tm_r, dim, out_dim, th, streamed, x2.dtype.itemsize, out_dtype.itemsize)
        if streamed:
            return _call_streamed(xr, params, tm=tm_r, th=th, out_dtype=out_dtype,
                                  vmem_limit_bytes=vmem)
        return _call_resident(xr, params, tm=tm_r, out_dtype=out_dtype, vmem_limit_bytes=vmem)

    if M <= tm:
        out2 = run(x2, M)
    elif M % tm == 0:
        out2 = run(x2, tm)
    else:
        # No jnp.pad (that rewrites the whole activation in HBM): prefer a row tile that divides
        # M exactly; otherwise run the remainder rows through a second small pallas_call.
        tm_div = next((c for c in range(tm - tm % 8, 63, -8) if M % c == 0), None)
        if tm_div is not None:
            out2 = run(x2, tm_div)
        else:
            m_full = (M // tm) * tm
            out2 = jnp.concatenate(
                [run(x2[:m_full], tm), run(x2[m_full:], M - m_full)], axis=0)

    return out2.reshape(*orig_shape[:-1], out_dim)


# ------------------------------- reference & demo ------------------------------------------------

def reference(x, gamma, beta, w1, b1, w2, b2):
    mu = jnp.mean(x, axis=-1, keepdims=True)
    var = jnp.mean((x - mu) ** 2, axis=-1, keepdims=True)
    xn = (x - mu) / jnp.sqrt(var + LN_EPS) * gamma + beta
    h = xn @ w1 + b1
    h = 0.5 * h * (1.0 + lax.erf(h * INV_SQRT2))
    return h @ w2 + b2


if __name__ == "__main__":
    # (batch, seq, dim) with feature dims multiples of 128 (lane-dense) and batch*seq = 768 so the
    # tm=256 grid has 3 row steps (both v7x TensorCores get work; scale up for real benchmarking).
    batch, seq, dim, out_dim = 4, 192, 256, 256
    key = jax.random.PRNGKey(0)
    kx, kg, kb, kw1, kb1, kw2, kb2 = jax.random.split(key, 7)

    x = jax.random.normal(kx, (batch, seq, dim), dtype=jnp.float32)

    # Synthetic parameters; torch-Linear weights would be transposed to (in, out) before this.
    gamma = 1.0 + 0.1 * jax.random.normal(kg, (dim,), dtype=jnp.float32)
    beta = 0.1 * jax.random.normal(kb, (dim,), dtype=jnp.float32)
    w1 = jax.random.normal(kw1, (dim, out_dim), dtype=jnp.float32) / math.sqrt(dim)
    b1 = 0.1 * jax.random.normal(kb1, (out_dim,), dtype=jnp.float32)
    w2 = jax.random.normal(kw2, (out_dim, out_dim), dtype=jnp.float32) / math.sqrt(out_dim)
    b2 = 0.1 * jax.random.normal(kb2, (out_dim,), dtype=jnp.float32)

    # One-time weight-load-time prep (LN fold, bf16 cast, bias reshape) — outside the hot path.
    params = prepare_ffn_params(gamma, beta, w1, b1, w2, b2)

    y_ref = reference(x, gamma, beta, w1, b1, w2, b2)

    # Path 1: VMEM-resident weights, Buffered(1) parameter blocks.
    y = jax.block_until_ready(feedforward_pallas(x, params, tm=256))
    assert y.shape == (batch, seq, out_dim), y.shape
    # bf16 MXU inputs (f32 accumulation) => loosen tolerance vs. the pure-f32 reference.
    assert jnp.allclose(y, y_ref, atol=5e-2, rtol=5e-2), float(jnp.max(jnp.abs(y - y_ref)))

    # Path 2: hidden-dim weight streaming (model-scale / v7x path), forced via th=128 here.
    y2 = jax.block_until_ready(feedforward_pallas(x, params, tm=256, th=128))
    assert y2.shape == (batch, seq, out_dim), y2.shape
    assert jnp.allclose(y2, y_ref, atol=5e-2, rtol=5e-2), float(jnp.max(jnp.abs(y2 - y_ref)))

    print("KERNEL_OK")
</pallas_src>

<mosaic_0001>
module attributes {stable_mosaic.version = 11 : i64} {
  func.func @ffn_resident_kernel(%arg0: i32, %arg1: memref<256x256xf32, #tpu.memory_space<vmem>>, %arg2: memref<256x256xbf16, #tpu.memory_space<vmem>>, %arg3: memref<1x256xf32, #tpu.memory_space<vmem>>, %arg4: memref<256x256xbf16, #tpu.memory_space<vmem>>, %arg5: memref<1x256xf32, #tpu.memory_space<vmem>>, %arg6: memref<256x256xf32, #tpu.memory_space<vmem>>) attributes {dimension_semantics = [#tpu.dimension_semantics<parallel>], iteration_bounds = array<i64: 3>, scalar_prefetch = 0 : i64, scratch_operands = 0 : i64, tpu.core_type = #tpu.core_type<tc>, window_params = [{transform_indices = @transform_0, window_bounds = array<i64: 256, 256>}, {pipeline_mode = #tpu.pipeline_mode<synchronous>, transform_indices = @transform_1, window_bounds = array<i64: 256, 256>}, {pipeline_mode = #tpu.pipeline_mode<synchronous>, transform_indices = @transform_2, window_bounds = array<i64: 1, 256>}, {pipeline_mode = #tpu.pipeline_mode<synchronous>, transform_indices = @transform_3, window_bounds = array<i64: 256, 256>}, {pipeline_mode = #tpu.pipeline_mode<synchronous>, transform_indices = @transform_4, window_bounds = array<i64: 1, 256>}, {transform_indices = @transform_5, window_bounds = array<i64: 256, 256>}]} {
    %c0 = arith.constant 0 : index
    %c0_0 = arith.constant 0 : index
    %0 = vector.load %arg1[%c0, %c0_0] : memref<256x256xf32, #tpu.memory_space<vmem>>, vector<256x256xf32>
    %cst = arith.constant dense<0.000000e+00> : vector<256xf32>
    %1 = vector.multi_reduction <add>, %0, %cst [1] : vector<256x256xf32> to vector<256xf32>
    %2 = vector.shape_cast %1 : vector<256xf32> to vector<256x1xf32>
    %cst_1 = arith.constant 2.560000e+02 : f32
    %3 = vector.broadcast %cst_1 : f32 to vector<256x1xf32>
    %4 = arith.divf %2, %3 : vector<256x1xf32>
    %5 = vector.broadcast %4 : vector<256x1xf32> to vector<256x256xf32>
    %6 = arith.subf %0, %5 : vector<256x256xf32>
    %7 = arith.mulf %6, %6 : vector<256x256xf32>
    %cst_2 = arith.constant dense<0.000000e+00> : vector<256xf32>
    %8 = vector.multi_reduction <add>, %7, %cst_2 [1] : vector<256x256xf32> to vector<256xf32>
    %9 = vector.shape_cast %8 : vector<256xf32> to vector<256x1xf32>
    %cst_3 = arith.constant 2.560000e+02 : f32
    %10 = vector.broadcast %cst_3 : f32 to vector<256x1xf32>
    %11 = arith.divf %9, %10 : vector<256x1xf32>
    %cst_4 = arith.constant 9.99999974E-6 : f32
    %12 = vector.broadcast %cst_4 : f32 to vector<256x1xf32>
    %13 = arith.addf %11, %12 : vector<256x1xf32>
    %14 = math.rsqrt %13 : vector<256x1xf32>
    %15 = vector.broadcast %14 : vector<256x1xf32> to vector<256x256xf32>
    %16 = arith.mulf %6, %15 : vector<256x256xf32>
    %17 = arith.truncf %16 : vector<256x256xf32> to vector<256x256xbf16>
    %c0_5 = arith.constant 0 : index
    %c0_6 = arith.constant 0 : index
    %18 = vector.load %arg2[%c0_5, %c0_6] : memref<256x256xbf16, #tpu.memory_space<vmem>>, vector<256x256xbf16>
    %cst_7 = arith.constant dense<0.000000e+00> : vector<256x256xf32>
    %19 = tpu.matmul %17, %18, %cst_7 {dimension_numbers = #tpu.dot_dimension_numbers<[1], [0], [0], [1], [0, 0, 1, 1], [], []>} : vector<256x256xbf16>, vector<256x256xbf16>, vector<256x256xf32> -> vector<256x256xf32>
    %c0_8 = arith.constant 0 : index
    %c0_9 = arith.constant 0 : index
    %20 = vector.load %arg3[%c0_8, %c0_9] : memref<1x256xf32, #tpu.memory_space<vmem>>, vector<1x256xf32>
    %21 = vector.broadcast %20 : vector<1x256xf32> to vector<256x256xf32>
    %22 = arith.addf %19, %21 : vector<256x256xf32>
    %cst_10 = arith.constant 5.000000e-01 : f32
    %23 = vector.broadcast %cst_10 : f32 to vector<256x256xf32>
    %24 = arith.mulf %23, %22 : vector<256x256xf32>
    %cst_11 = arith.constant 0.707106769 : f32
    %25 = vector.broadcast %cst_11 : f32 to vector<256x256xf32>
    %26 = arith.mulf %22, %25 : vector<256x256xf32>
    %27 = math.erf %26 : vector<256x256xf32>
    %cst_12 = arith.constant 1.000000e+00 : f32
    %28 = vector.broadcast %cst_12 : f32 to vector<256x256xf32>
    %29 = arith.addf %28, %27 : vector<256x256xf32>
    %30 = arith.mulf %24, %29 : vector<256x256xf32>
    %31 = arith.truncf %30 : vector<256x256xf32> to vector<256x256xbf16>
    %c0_13 = arith.constant 0 : index
    %c0_14 = arith.constant 0 : index
    %32 = vector.load %arg4[%c0_13, %c0_14] : memref<256x256xbf16, #tpu.memory_space<vmem>>, vector<256x256xbf16>
    %cst_15 = arith.constant dense<0.000000e+00> : vector<256x256xf32>
    %33 = tpu.matmul %31, %32, %cst_15 {dimension_numbers = #tpu.dot_dimension_numbers<[1], [0], [0], [1], [0, 0, 1, 1], [], []>} : vector<256x256xbf16>, vector<256x256xbf16>, vector<256x256xf32> -> vector<256x256xf32>
    %c0_16 = arith.constant 0 : index
    %c0_17 = arith.constant 0 : index
    %34 = vector.load %arg5[%c0_16, %c0_17] : memref<1x256xf32, #tpu.memory_space<vmem>>, vector<1x256xf32>
    %35 = vector.broadcast %34 : vector<1x256xf32> to vector<256x256xf32>
    %36 = arith.addf %33, %35 : vector<256x256xf32>
    %c0_18 = arith.constant 0 : index
    %c0_19 = arith.constant 0 : index
    %37 = vector.load %arg6[%c0_18, %c0_19] : memref<256x256xf32, #tpu.memory_space<vmem>>, vector<256x256xf32>
    tpu.vector_store %arg6[%c0_18, %c0_19], %36 {strides = array<i32>} : memref<256x256xf32, #tpu.memory_space<vmem>>, vector<256x256xf32>,
    return
  }
  func.func @transform_0(%arg0: i32) -> (i32, i32) {
    %c0_i32 = arith.constant 0 : i32
    %c0_i32_0 = arith.constant 0 : i32
    return %arg0, %c0_i32 : i32, i32
  }
  func.func @transform_1(%arg0: i32) -> (i32, i32) {
    %c0_i32 = arith.constant 0 : i32
    %c0_i32_0 = arith.constant 0 : i32
    %c0_i32_1 = arith.constant 0 : i32
    return %c0_i32, %c0_i32_0 : i32, i32
  }
  func.func @transform_2(%arg0: i32) -> (i32, i32) {
    %c0_i32 = arith.constant 0 : i32
    %c0_i32_0 = arith.constant 0 : i32
    %c0_i32_1 = arith.constant 0 : i32
    return %c0_i32, %c0_i32_0 : i32, i32
  }
  func.func @transform_3(%arg0: i32) -> (i32, i32) {
    %c0_i32 = arith.constant 0 : i32
    %c0_i32_0 = arith.constant 0 : i32
    %c0_i32_1 = arith.constant 0 : i32
    return %c0_i32, %c0_i32_0 : i32, i32
  }
  func.func @transform_4(%arg0: i32) -> (i32, i32) {
    %c0_i32 = arith.constant 0 : i32
    %c0_i32_0 = arith.constant 0 : i32
    %c0_i32_1 = arith.constant 0 : i32
    return %c0_i32, %c0_i32_0 : i32, i32
  }
  func.func @transform_5(%arg0: i32) -> (i32, i32) {
    %c0_i32 = arith.constant 0 : i32
    %c0_i32_0 = arith.constant 0 : i32
    return %arg0, %c0_i32 : i32, i32
  }
}

</mosaic_0001>

<bundles_post_ra>
// kernel: tpu_custom_call.1
= control target key start
LH: loop header
LB: loop body
LE: loop exit
PB: predicated region body
PF: predicated region fallthrough
CT: control target
= control target key end

     0   :  { %10 = vsyncpa [#allocation3], 0  ;;  %s4081_s0 = inlined_call_operand.hbm [shape: f32[768,256], index: 0, kind: input, shape index: {}]   ;;  %s4082_s1 = inlined_call_operand.hbm [shape: bf16[256,256], index: 1, kind: input, shape index: {}]   ;;  %s4083_s2 = inlined_call_operand.vmem [shape: f32[1,256], index: 2, kind: input, shape index: {}]   ;;  %s4084_s3 = inlined_call_operand.hbm [shape: bf16[256,256], index: 3, kind: input, shape index: {}]   ;;  %s4085_s4 = inlined_call_operand.vmem [shape: f32[1,256], index: 4, kind: input, shape index: {}]   ;;  %s4086_s5 = inlined_call_operand.hbm [shape: f32[768,256], index: 5, kind: output, shape index: {}]  }
   0x1   :  { %12 = vsyncpa [#allocation3 + $0x1], 0 }
   0x2   :  { %13 = vsyncpa [#allocation6], 0 }
   0x3   :  { %14 = vsyncpa [#allocation4], 0 }
   0x4   :  { %16 = vsyncpa [#allocation4 + $0x1], 0  ;;  %s2840_s18 = smov 0   ;;  %s2842_s19 = smov 0  }
   0x5   :  { %s2844_s20 = smov 0   ;;  %s2846_s21 = smov 0  }
   0x6 LB: > { %s2861_s22 = sadd.s32 4294967295, %s2798_s21   ;;  %s2201_s23 = sadd.s32 4294967294, %s2798_s21   ;;  %s2798_s21 = sphi %s2846_s21, %s4164_s21   ;;  %s2794_s20 = sphi %s2844_s20, %s4163_s20   ;;  %s2790_s19 = sphi %s2842_s19, %s4162_s19   ;;  %s2786_s18 = sphi %s2840_s18, %s4161_s18  }
   0x7   : > { %p42_p0 = scmp.ne.s32.totalorder %s2790_s19, %s2786_s18  ;;  %p4087_p1 = scmp.eq.s32.totalorder %s2861_s22, 0 }
   0x8   : > { %p156_p3 = scmp.eq.s32.totalorder %s2201_s23, 2  ;;  %p2202_p5 = scmp.ge.s32.totalorder %s2798_s21, 1 }
   0x9   : > { %p2870_p4 = por %p4087_p1, %p42_p0  ;;  %p163_p7 = scmp.lt.s32.totalorder %s2798_s21, 4 }
   0xa   : > { %p2875_p6 = por %p156_p3, %p42_p0  ;;  %s2800_s27 = smov [#allocation5]  }
   0xb   : > { %s4110_s24 = scalar_select %p2870_p4, 1, 0 }
   0xc   : > { %s4111_s25 = scalar_select %p2875_p6, 1, 0 }
   0xd   : > { %p2880_p8 = pnand %p2202_p5, %p163_p7  ;;  %s175_s28 = sshll.u32 %s2800_s27, 4  ;;  %s176_s28 = int_to_ptr.vmem [resolvable:$true] %s175_s28 }
   0xe   : > { %s2801_s30 = smov [#allocation7]   ;;  %s2661_s7 = scalar_lea.vmem %s176_s28, 4096 }
   0xf   : > { %s4112_s26 = scalar_select %p2880_p8, 1, 0 }
  0x10   : > { %p2301_p9 = pneg %p2880_p8  ;;  %s191_s6 = sshll.u32 %s2801_s30, 4  ;;  %s192_s6 = int_to_ptr.vmem [resolvable:$true] %s191_s6 }
  0x11   : > { %p2662_p12 = scmp.ne.s32.totalorder %s176_s28, %s2661_s7  ;;  %p2669_p3 = scmp.lt.s32.totalorder %s176_s28, %s176_s28 }
  0x12   : > { %p2888_p10 = pnand %p2301_p9, %p4087_p1  ;;  %p2670_p5 = scmp.lt.s32.totalorder %s2661_s7, %s2661_s7 }
  0x14   : > { %p2652_p11 = pneg %p2888_p10  ;;  %p2671_p7 = por %p2670_p5, %p2669_p3 }
  0x16   : > { %p2664_p13 = pnand %p2662_p12, %p2652_p11 }
  0x18   : > { %p2665_p0 = pneg %p2664_p13 }
  0x1a   : > { %p2672_p9 = pnand %p2671_p7, %p2665_p0 }
  0x1c   : > { %2675 = shalt.err (!%p2672_p9)
}
  0x1d   : > { %s2802_s8 = smov 128   ;;  %s2803_s9 = smov 8  }
  0x1e   : > { %2304 = dma.hbm_to_vmem [thread:$0]  (!%p2888_p10), %s4082_s1, 4096, %s176_s28, [#allocation6], %s2802_s8, %s2802_s8, %s2803_s9  }
  0x1f   : > { %s2687_s12 = scalar_lea.vmem %s192_s6, 4096  ;;  %p2695_p2 = scmp.lt.s32.totalorder %s192_s6, %s192_s6 }
  0x20   : > { %p2688_p1 = scmp.ne.s32.totalorder %s192_s6, %s2687_s12  ;;  %p2696_p6 = scmp.lt.s32.totalorder %s2687_s12, %s2687_s12 }
  0x22   : > { %p2690_p12 = pnand %p2688_p1, %p2652_p11  ;;  %p2697_p3 = por %p2696_p6, %p2695_p2 }
  0x24   : > { %p2691_p13 = pneg %p2690_p12 }
  0x26   : > { %p2698_p0 = pnand %p2697_p3, %p2691_p13 }
  0x28   : > { %2701 = shalt.err (!%p2698_p0)
}
  0x29   : > { %2307 = dma.hbm_to_vmem [thread:$0]  (!%p2888_p10), %s4084_s3, 4096, %s192_s6, [#allocation6], %s2802_s8, %s2802_s8, %s2803_s9  }
  0x2a   : > { %s2911_s15 = sadd.s32 1, %s2798_s21   ;;  %s29_s16 = sadd.s32 1, %s2794_s20 }
  0x2b   : > { %s26_s17 = ssub.s32 %s2798_s21, %s2911_s15  ;;  %p36_p1 = scmp.ne.s32.totalorder %s2794_s20, %s2790_s19 }
  0x2c   : > { %p27_p2 = scmp.eq.s32.totalorder %s26_s17, 0  ;;  %p37_p6 = scmp.eq.s32.totalorder %s2798_s21, 0 }
  0x2d   : > { %p4114_p11 = scmp.eq.s32.totalorder %s2861_s22, 2  ;;  %p2318_p7 = scmp.lt.s32.totalorder %s2798_s21, 3 }
  0x2e   : > { %s2927_s27 = scalar_select %p27_p2, %s2794_s20, %s29_s16  }
  0x2f   : > { %p2921_p5 = por %p4114_p11, %p36_p1  ;;  %p38_p9 = por %p37_p6, %p36_p1 }
  0x30   : > { %s208_s28 = sand.u32 1, %s2794_s20   ;;  %s2286_s30 = sshll.u32 %s2798_s21, 13 }
  0x31   : > { %s4115_s23 = scalar_select %p2921_p5, 1, 0 }
  0x32   : > { %s2206_s29 = sshll.u32 %s208_s28, 9  ;;  %s2934_s8 = scalar_lea.hbm %s4081_s0, %s2286_s30 }
  0x33   : > { %s212_s9 = scalar_lea.vmem [#allocation2], %s2206_s29  ;;  %p2938_p10 = pnand %p2318_p7, %p38_p9 }
  0x34   : > { %s220_s10 = sshll.u32 %s212_s9, 4  ;;  %s2942_s12 = scalar_lea.sflag [#allocation3], %s208_s28  ;;  %s2936_s10 = int_to_ptr.vmem [resolvable:$true] %s220_s10 }
  0x35   : > { %s2702_s13 = scalar_lea.hbm %s2934_s8, 8192  ;;  %p2704_p13 = pneg %p2938_p10 }
  0x36   : > { %p2703_p12 = scmp.ne.s32.totalorder %s2934_s8, %s2702_s13  ;;  %s2707_s17 = scalar_lea.hbm %s4081_s0, 24576 }
  0x37   : > { %p2708_p1 = scmp.lt.s32.totalorder %s2934_s8, %s4081_s0  ;;  %p2709_p2 = scmp.lt.s32.totalorder %s2707_s17, %s2702_s13 }
  0x38   : > { %p2705_p3 = pnand %p2704_p13, %p2703_p12 }
  0x39   : > { %p2710_p6 = por %p2709_p2, %p2708_p1 }
  0x3a   : > { %p2706_p0 = pneg %p2705_p3 }
  0x3c   : > { %p2711_p11 = pnand %p2710_p6, %p2706_p0 }
  0x3e   : > { %2714 = shalt.err (!%p2711_p11)
}
  0x3f   : > { %s2715_s28 = scalar_lea.vmem %s2936_s10, 8192  ;;  %s2804_s6 = smov [#allocation2]  }
  0x40   : > { %p2716_p7 = scmp.ne.s32.totalorder %s2936_s10, %s2715_s28  ;;  %s2720_s7 = sshll.u32 %s2804_s6, 4  ;;  %s2721_s7 = int_to_ptr.vmem [resolvable:$false] %s2720_s7 }
  0x41   : > { %s2722_s9 = scalar_lea.vmem %s2721_s7, 16384  ;;  %p2723_p3 = scmp.lt.s32.totalorder %s2936_s10, %s2721_s7 }
  0x42   : > { %p2718_p9 = pnand %p2716_p7, %p2704_p13  ;;  %p2724_p5 = scmp.lt.s32.totalorder %s2722_s9, %s2715_s28 }
  0x44   : > { %p2719_p12 = pneg %p2718_p9  ;;  %p2725_p4 = por %p2724_p5, %p2723_p3 }
  0x46   : > { %p2726_p8 = pnand %p2725_p4, %p2719_p12 }
  0x48   : > { %2729 = shalt.err (!%p2726_p8)
}
  0x49   : > { %s2805_s13 = smov 256   ;;  %s2806_s14 = smov 16  }
  0x4a   : > { %2311 = dma.hbm_to_vmem [thread:$0]  (!%p2938_p10), %s2934_s8, 8192, %s2936_s10, %s2942_s12, %s2805_s13, %s2805_s13, %s2806_s14  }
  0x4b   : > { %p4117_p13 = scmp.ne.s32.totalorder %s4112_s26, 0 }
  0x4d   : > { %232 = sbr.rel (%p4117_p13) target bundleno = 1033 (0x409), region = 40 }
  0x52   : > { %s2966_s16 = sand.u32 1, %s2790_s19   ;;  %p4118_p4 = scmp.ne.s32.totalorder %s4110_s24, 0 }
  0x53   : > { %s2211_s17 = sshll.u32 %s2966_s16, 9  ;;  %s235_s29 = scalar_lea.sflag [#allocation3], %s2966_s16 }
  0x54   : > { %s2972_s30 = scalar_lea.vmem [#allocation2], %s2211_s17 }
  0x55   : > { %2773 = dma.done.wait (%p4118_p4), %s235_s29, 8192  }
  0x56   : > { %2775 = vsyncadd (%p4118_p4), %s235_s29, 4294959104  ;;  %p4119_p8 = scmp.eq.s32.totalorder %s2861_s22, 0 }
  0x58   : > { %2777 = dma.done.wait (%p4119_p8), [#allocation6], 8192   ;;  %p4120_p5 = pmov %p4119_p8 }
  0x59   : > { %v2983_v0 = vld [vmem:[%s2972_s30] sm:$0xff]  ;;  %v2986_v1 = vld [vmem:[%s2972_s30 + $0x8] sm:$0xff]  ;;  %v2989_v2 = vld [vmem:[%s2972_s30 + $0x10] sm:$0xff]  ;;  %s3903_s11 = scalar_lea.vmem [#allocation8], %s2211_s17  ;;  %s2288_s12 = sshll.u32 %s2861_s22, 13 }
  0x5a   : > { %2779 = vsyncadd (%p4120_p5), [#allocation6], 4294959104  ;;  %v339_v3 = vadd.f32 %v2986_v1, %v2983_v0  ;;  %v2994_v4 = vld [vmem:[%s2972_s30 + $0x18] sm:$0xff]  ;;  %v2997_v5 = vld [vmem:[%s2972_s30 + $0x20] sm:$0xff]  ;;  %s2109_s28 = sshll.u32 %s3903_s11, 4  ;;  %s4034_s9 = scalar_lea.hbm %s4086_s5, %s2288_s12  ;;  %s4036_s28 = int_to_ptr.vmem [resolvable:$true] %s2109_s28 }
  0x5b   : > { %v3000_v6 = vld [vmem:[%s2972_s30 + $0x28] sm:$0xff]  ;;  %v3005_v8 = vld [vmem:[%s2972_s30 + $0x30] sm:$0xff]  ;;  %v3008_v9 = vld [vmem:[%s2972_s30 + $0x38] sm:$0xff]  ;;  %v342_v10 = vadd.f32 %v2994_v4, %v2989_v2  ;;  %s2095_s22 = scalar_lea.sflag [#allocation4], %s2966_s16  ;;  %s2730_s13 = scalar_lea.vmem %s4036_s28, 8192 }
  0x5c   : > { %v345_v7 = vadd.f32 %v3000_v6, %v2997_v5  ;;  %340 = vadd.xlane.f32.xlu0 %v339_v3  ;;  %v348_v11 = vadd.f32 %v3008_v9, %v3005_v8  ;;  %v3015_v12 = vld [vmem:[%s2972_s30 + $0x40] sm:$0xff]  ;;  %v3018_v13 = vld [vmem:[%s2972_s30 + $0x48] sm:$0xff]  ;;  %v3021_v14 = vld [vmem:[%s2972_s30 + $0x50] sm:$0xff]  ;;  %p2731_p10 = scmp.ne.s32.totalorder %s4036_s28, %s2730_s13  ;;  %p4159_p0 = scmp.ne.s32.totalorder %s4115_s23, 0 }
  0x5d   : > { %v3024_v15 = vld [vmem:[%s2972_s30 + $0x58] sm:$0xff]  ;;  %v351_v16 = vadd.f32 %v3018_v13, %v3015_v12  ;;  %v3031_v18 = vld [vmem:[%s2972_s30 + $0x60] sm:$0xff]  ;;  %v3034_v19 = vld [vmem:[%s2972_s30 + $0x68] sm:$0xff]  ;;  %s2807_s14 = smov [#allocation8]  }
  0x5e   : > { %346 = vadd.xlane.f32.xlu1 %v345_v7  ;;  %v354_v17 = vadd.f32 %v3024_v15, %v3021_v14  ;;  %v3037_v20 = vld [vmem:[%s2972_s30 + $0x70] sm:$0xff]  ;;  %v3040_v21 = vld [vmem:[%s2972_s30 + $0x78] sm:$0xff]  ;;  %v357_v22 = vadd.f32 %v3034_v19, %v3031_v18  ;;  %v3047_v24 = vld [vmem:[%s2972_s30 + $0x80] sm:$0xff]  ;;  %p2732_p1 = pnand %p2731_p10, %p4159_p0  ;;  %s2734_s17 = sshll.u32 %s2807_s14, 4  ;;  %s2735_s17 = int_to_ptr.vmem [resolvable:$false] %s2734_s17 }
  0x5f   : > { %v360_v23 = vadd.f32 %v3040_v21, %v3037_v20  ;;  %v3050_v25 = vld [vmem:[%s2972_s30 + $0x88] sm:$0xff]  ;;  %v3053_v26 = vld [vmem:[%s2972_s30 + $0x90] sm:$0xff]  ;;  %v3056_v27 = vld [vmem:[%s2972_s30 + $0x98] sm:$0xff]  ;;  %s2736_s29 = scalar_lea.vmem %s2735_s17, 16384  ;;  %p2737_p6 = scmp.lt.s32.totalorder %s4036_s28, %s2735_s17 }
  0x60   : > { %343 = vadd.xlane.f32.xlu0 %v342_v10  ;;  %v3059_v28 = vld [vmem:[%s2972_s30 + $0xa0] sm:$0xff]  ;;  %v3062_v29 = vld [vmem:[%s2972_s30 + $0xa8] sm:$0xff]  ;;  %v363_v30 = vadd.f32 %v3050_v25, %v3047_v24  ;;  %v3067_v31 = vld [vmem:[%s2972_s30 + $0xb0] sm:$0xff]  ;;  %v366_v33 = vadd.f32 %v3056_v27, %v3053_v26  ;;  %p2733_p2 = pneg %p2732_p1  ;;  %p2738_p11 = scmp.lt.s32.totalorder %s2736_s29, %s2730_s13 }
  0x61   : > { %v3070_v32 = vld [vmem:[%s2972_s30 + $0xb8] sm:$0xff]  ;;  %v3075_v34 = vld [vmem:[%s2972_s30 + $0xc0] sm:$0xff]  ;;  %v3078_v35 = vld [vmem:[%s2972_s30 + $0xc8] sm:$0xff]  ;;  %v369_v36 = vadd.f32 %v3062_v29, %v3059_v28 }
  0x62   : > { %349 = vadd.xlane.f32.xlu1 %v348_v11  ;;  %v372_v37 = vadd.f32 %v3070_v32, %v3067_v31  ;;  %v3085_v38 = vld [vmem:[%s2972_s30 + $0xd0] sm:$0xff]  ;;  %v3088_v39 = vld [vmem:[%s2972_s30 + $0xd8] sm:$0xff]  ;;  %v3091_v40 = vld [vmem:[%s2972_s30 + $0xe0] sm:$0xff]  ;;  %v375_v42 = vadd.f32 %v3078_v35, %v3075_v34  ;;  %p2739_p7 = por %p2738_p11, %p2737_p6 }
  0x63   : > { %v3094_v41 = vld [vmem:[%s2972_s30 + $0xe8] sm:$0xff]  ;;  %v3099_v43 = vld [vmem:[%s2972_s30 + $0xf0] sm:$0xff]  ;;  %v3102_v44 = vld [vmem:[%s2972_s30 + $0xf8] sm:$0xff]  ;;  %v378_v45 = vadd.f32 %v3088_v39, %v3085_v38 }
  0x64   : > { %352 = vadd.xlane.f32.xlu0 %v351_v16  ;;  %v3107_v46 = vld [vmem:[%s2972_s30 + $0x100] sm:$0xff]  ;;  %v3110_v47 = vld [vmem:[%s2972_s30 + $0x108] sm:$0xff]  ;;  %v381_v48 = vadd.f32 %v3094_v41, %v3091_v40  ;;  %v384_v49 = vadd.f32 %v3102_v44, %v3099_v43  ;;  %v3117_v50 = vld [vmem:[%s2972_s30 + $0x110] sm:$0xff]  ;;  %p2740_p9 = pnand %p2739_p7, %p2733_p2 }
  0x65   : > { %v3120_v51 = vld [vmem:[%s2972_s30 + $0x118] sm:$0xff]  ;;  %v3123_v52 = vld [vmem:[%s2972_s30 + $0x120] sm:$0xff]  ;;  %v3126_v53 = vld [vmem:[%s2972_s30 + $0x128] sm:$0xff]  ;;  %v387_v54 = vadd.f32 %v3110_v47, %v3107_v46 }
  0x66   : > { %355 = vadd.xlane.f32.xlu1 %v354_v17  ;;  %v390_v55 = vadd.f32 %v3120_v51, %v3117_v50  ;;  %v3133_v56 = vld [vmem:[%s2972_s30 + $0x130] sm:$0xff]  ;;  %v3136_v57 = vld [vmem:[%s2972_s30 + $0x138] sm:$0xff]  ;;  %v393_v58 = vadd.f32 %v3126_v53, %v3123_v52  ;;  %v2365_v62 = vld [vmem:[#allocation5 + $0x64] ss:$8 sps:$4 sm:$0xff]  }
  0x67   : > { %v396_v59 = vadd.f32 %v3136_v57, %v3133_v56  ;;  %v2362_v60 = vld [vmem:[#allocation5 + $0x74] ss:$8 sps:$4 sm:$0xff]   ;;  %v2364_v61 = vld [vmem:[#allocation5 + $0x70] ss:$8 sps:$4 sm:$0xff]   ;;  %v2367_v63 = vld [vmem:[#allocation5 + $0x60] ss:$8 sps:$4 sm:$0xff]  }
  0x68   : > { %358 = vadd.xlane.f32.xlu0 %v357_v22  ;;  %1088 = vmatprep.subr.bf16.mxu0 %v2362_v60  ;;  %v2368_v3 = vld [vmem:[#allocation5 + $0x54] ss:$8 sps:$4 sm:$0xff]   ;;  %v2370_v7 = vld [vmem:[#allocation5 + $0x50] ss:$8 sps:$4 sm:$0xff]   ;;  %v2371_v10 = vld [vmem:[#allocation5 + $0x44] ss:$8 sps:$4 sm:$0xff]  }
  0x69   : > { %1089 = vmatpush1.bf16.msra.mxu0 %v2364_v61  ;;  %v2373_v11 = vld [vmem:[#allocation5 + $0x40] ss:$8 sps:$4 sm:$0xff]   ;;  %v2374_v16 = vld [vmem:[#allocation5 + $0x34] ss:$8 sps:$4 sm:$0xff]   ;;  %v2376_v17 = vld [vmem:[#allocation5 + $0x30] ss:$8 sps:$4 sm:$0xff]  }
  0x6a   : > { %361 = vadd.xlane.f32.xlu1 %v360_v23  ;;  %1090 = vmatprep.subr.bf16.mxu0 %v2365_v62  ;;  %v2377_v22 = vld [vmem:[#allocation5 + $0x24] ss:$8 sps:$4 sm:$0xff]   ;;  %v2379_v23 = vld [vmem:[#allocation5 + $0x20] ss:$8 sps:$4 sm:$0xff]  }
  0x6c   : > { %364 = vadd.xlane.f32.xlu0 %v363_v30  ;;  %v2380_v30 = vld [vmem:[#allocation5 + $0x14] ss:$8 sps:$4 sm:$0xff]  }
  0x6d   : > { %1091 = vmatpush1.bf16.msra.mxu0 %v2367_v63 }
  0x6e   : > { %367 = vadd.xlane.f32.xlu1 %v366_v33  ;;  %1092 = vmatprep.subr.bf16.mxu0 %v2368_v3  ;;  %v2382_v33 = vld [vmem:[#allocation5 + $0x10] ss:$8 sps:$4 sm:$0xff]  }
  0x70   : > { %370 = vadd.xlane.f32.xlu0 %v369_v36  ;;  %v2383_v36 = vld [vmem:[#allocation5 + $0x4] ss:$8 sps:$4 sm:$0xff]  }
  0x71   : > { %1093 = vmatpush1.bf16.msra.mxu0 %v2370_v7 }
  0x72   : > { %373 = vadd.xlane.f32.xlu1 %v372_v37  ;;  %1094 = vmatprep.subr.bf16.mxu0 %v2371_v10  ;;  %v2385_v37 = vld [vmem:[#allocation5] ss:$8 sps:$4 sm:$0xff]  }
  0x74   : > { %376 = vadd.xlane.f32.xlu0 %v375_v42  ;;  %v2386_v42 = vld [vmem:[#allocation5 + $0xf4] ss:$8 sps:$4 sm:$0xff]  }
  0x75   : > { %1095 = vmatpush1.bf16.msra.mxu0 %v2373_v11 }
  0x76   : > { %379 = vadd.xlane.f32.xlu1 %v378_v45  ;;  %1096 = vmatprep.subr.bf16.mxu0 %v2374_v16  ;;  %v2388_v45 = vld [vmem:[#allocation5 + $0xf0] ss:$8 sps:$4 sm:$0xff]  }
  0x78   : > { %382 = vadd.xlane.f32.xlu0 %v381_v48  ;;  %v2389_v48 = vld [vmem:[#allocation5 + $0xe4] ss:$8 sps:$4 sm:$0xff]  }
  0x79   : > { %1097 = vmatpush1.bf16.msra.mxu0 %v2376_v17 }
  0x7a   : > { %385 = vadd.xlane.f32.xlu1 %v384_v49  ;;  %1098 = vmatprep.subr.bf16.mxu0 %v2377_v22 }
  0x7c   : > { %388 = vadd.xlane.f32.xlu0 %v387_v54 }
  0x7d   : > { %1099 = vmatpush1.bf16.msra.mxu0 %v2379_v23 }
  0x7e   : > { %391 = vadd.xlane.f32.xlu1 %v390_v55  ;;  %1100 = vmatprep.subr.bf16.mxu0 %v2380_v30 }
  0x80   : > { %394 = vadd.xlane.f32.xlu0 %v393_v58 }
  0x81   : > { %1101 = vmatpush1.bf16.msra.mxu0 %v2382_v33 }
  0x82   : > { %397 = vadd.xlane.f32.xlu1 %v396_v59  ;;  %1102 = vmatprep.subr.bf16.mxu0 %v2383_v36 }
  0x85   : > { %1103 = vmatpush1.bf16.msra.mxu0 %v2385_v37 }
  0x86   : > { %1104 = vmatprep.subr.bf16.mxu0 %v2386_v42  ;;  %v3187_v42 = vld [vmem:[%s2972_s30 + $0x150] sm:$0xff] }
  0x89   : > { %1105 = vmatpush2.bf16.msra.mxu0 %v2388_v45  ;;  %v3190_v45 = vld [vmem:[%s2972_s30 + $0x158] sm:$0xff] }
  0x8a   : > { %1106 = vmatprep.subr.bf16.mxu0 %v2389_v48 }
  0xe5   : > { %v341_v49 = vpop.xlane.xlu0 %340 }
  0xe6   : > { %v436_v54 = vmul.f32 0.00390625, %v341_v49 }
  0xe7   : > { %v347_v55 = vpop.xlane.xlu1 %346 }
  0xe8   : > { %v438_v58 = vmul.f32 0.00390625, %v347_v55  ;;  %v3143_v59 = vsub.f32 %v2983_v0, %v436_v54  ;;  %v3146_v60 = vsub.f32 %v2986_v1, %v436_v54  ;;  %v3159_v0 = vld [vmem:[%s2972_s30 + $0x140] sm:$0xff]  ;;  %v3162_v1 = vld [vmem:[%s2972_s30 + $0x148] sm:$0xff] }
  0xe9   : > { %v344_v61 = vpop.xlane.xlu0 %343  ;;  %v399_v23 = vadd.f32 %v3162_v1, %v3159_v0 }
  0xea   : > { %v3149_v62 = vsub.f32 %v2997_v5, %v438_v58  ;;  %v3152_v63 = vsub.f32 %v3000_v6, %v438_v58  ;;  %v437_v3 = vmul.f32 0.00390625, %v344_v61  ;;  %v532_v7 = vmul.f32 %v3143_v59, %v3143_v59 }
  0xeb   : > { %v533_v10 = vmul.f32 %v3146_v60, %v3146_v60  ;;  %v350_v11 = vpop.xlane.xlu1 %349 }
  0xec   : > { %v439_v16 = vmul.f32 0.00390625, %v350_v11  ;;  %v3165_v5 = vsub.f32 %v2989_v2, %v437_v3  ;;  %v3168_v6 = vsub.f32 %v2994_v4, %v437_v3  ;;  %v536_v33 = vmul.f32 %v3149_v62, %v3149_v62 }
  0xed   : > { %v596_v17 = vadd.f32 %v533_v10, %v532_v7  ;;  %v353_v30 = vpop.xlane.xlu0 %352  ;;  %v537_v36 = vmul.f32 %v3152_v63, %v3152_v63  ;;  %v3203_v7 = vld [vmem:[%s2972_s30 + $0x160] sm:$0xff]  ;;  %v3206_v10 = vld [vmem:[%s2972_s30 + $0x168] sm:$0xff] }
  0xee   : > { %v3171_v22 = vsub.f32 %v3005_v8, %v439_v16  ;;  %v3180_v2 = vsub.f32 %v3008_v9, %v439_v16  ;;  %v534_v4 = vmul.f32 %v3165_v5, %v3165_v5  ;;  %v535_v8 = vmul.f32 %v3168_v6, %v3168_v6 }
  0xef   : > { %597 = vadd.xlane.f32.xlu0 %v596_v17  ;;  %v440_v37 = vmul.f32 0.00390625, %v353_v30  ;;  %v356_v48 = vpop.xlane.xlu1 %355  ;;  %v602_v54 = vadd.f32 %v537_v36, %v536_v33  ;;  %v402_v9 = vadd.f32 %v3190_v45, %v3187_v42  ;;  %v3219_v33 = vld [vmem:[%s2972_s30 + $0x170] sm:$0xff]  ;;  %v3222_v36 = vld [vmem:[%s2972_s30 + $0x178] sm:$0xff] }
  0xf0   : > { %v599_v49 = vadd.f32 %v535_v8, %v534_v4  ;;  %v441_v55 = vmul.f32 0.00390625, %v356_v48  ;;  %v538_v58 = vmul.f32 %v3171_v22, %v3171_v22  ;;  %v539_v11 = vmul.f32 %v3180_v2, %v3180_v2  ;;  %v2391_v8 = vld [vmem:[#allocation5 + $0xe0] ss:$8 sps:$4 sm:$0xff]  }
  0xf1   : > { %v3197_v61 = vsub.f32 %v3015_v12, %v440_v37  ;;  %v3200_v3 = vsub.f32 %v3018_v13, %v440_v37  ;;  %v359_v16 = vpop.xlane.xlu0 %358  ;;  %v405_v12 = vadd.f32 %v3206_v10, %v3203_v7  ;;  %1107 = vmatpush2.bf16.msra.mxu0 %v2391_v8  ;;  %v408_v37 = vadd.f32 %v3222_v36, %v3219_v33  ;;  %v2394_v8 = vld [vmem:[#allocation5 + $0xd0] ss:$8 sps:$4 sm:$0xff]  }
  0xf2   : > { %600 = vadd.xlane.f32.xlu1 %v599_v49  ;;  %v3211_v17 = vsub.f32 %v3021_v14, %v441_v55  ;;  %v605_v13 = vadd.f32 %v539_v11, %v538_v58  ;;  %v442_v30 = vmul.f32 0.00390625, %v359_v16  ;;  %v3241_v16 = vld [vmem:[%s2972_s30 + $0x180] sm:$0xff] }
  0xf3   : > { %400 = vadd.xlane.f32.xlu0 %v399_v23  ;;  %4121 = vst [vmem:[#allocation12_spill] sm:$0xff] %v3197_v61  ;;  %4122 = vst [vmem:[#allocation13_spill] sm:$0xff] %v3200_v3  ;;  %v3214_v23 = vsub.f32 %v3024_v15, %v441_v55  ;;  %v540_v4 = vmul.f32 %v3197_v61, %v3197_v61  ;;  %v541_v14 = vmul.f32 %v3200_v3, %v3200_v3  ;;  %v362_v15 = vpop.xlane.xlu1 %361  ;;  %v3258_v61 = vld [vmem:[%s2972_s30 + $0x198] sm:$0xff]  ;;  %v3316_v3 = vld [vmem:[%s2972_s30 + $0x1c8] sm:$0xff] }
  0xf4   : > { %4123 = vst [vmem:[#allocation14_spill] sm:$0xff] %v3211_v17  ;;  %v443_v48 = vmul.f32 0.00390625, %v362_v15  ;;  %v542_v49 = vmul.f32 %v3211_v17, %v3211_v17  ;;  %v3235_v55 = vsub.f32 %v3031_v18, %v442_v30  ;;  %v3238_v58 = vsub.f32 %v3034_v19, %v442_v30  ;;  %v3244_v15 = vld [vmem:[%s2972_s30 + $0x188] sm:$0xff] }
  0xf5   : > { %4124 = vst [vmem:[#allocation15_spill] sm:$0xff] %v3214_v23  ;;  %v608_v11 = vadd.f32 %v541_v14, %v540_v4  ;;  %v365_v17 = vpop.xlane.xlu0 %364  ;;  %v411_v19 = vadd.f32 %v3244_v15, %v3241_v16  ;;  %v3255_v14 = vld [vmem:[%s2972_s30 + $0x190] sm:$0xff] }
  0xf6   : > { %403 = vadd.xlane.f32.xlu1 %v402_v9  ;;  %v2392_v9 = vld [vmem:[#allocation5 + $0xd4] ss:$8 sps:$4 sm:$0xff]   ;;  %4125 = vst [vmem:[#allocation16_spill] sm:$0xff] %v3235_v55  ;;  %4126 = vst [vmem:[#allocation17_spill] sm:$0xff] %v3238_v58  ;;  %v3250_v18 = vsub.f32 %v3040_v21, %v443_v48  ;;  %v444_v4 = vmul.f32 0.00390625, %v365_v17 }
  0xf7   : > { %603 = vadd.xlane.f32.xlu0 %v602_v54  ;;  %v543_v54 = vmul.f32 %v3214_v23, %v3214_v23  ;;  %1108 = vmatprep.subr.bf16.mxu0 %v2392_v9  ;;  %v544_v9 = vmul.f32 %v3235_v55, %v3235_v55  ;;  %v368_v21 = vpop.xlane.xlu1 %367  ;;  %v3294_v23 = vld [vmem:[%s2972_s30 + $0x1b8] sm:$0xff] }
  0xf8   : > { %1109 = vmatpush2.bf16.msra.mxu0 %v2394_v8  ;;  %4128 = vst [vmem:[#allocation19_spill] sm:$0xff] %v3250_v18  ;;  %v445_v17 = vmul.f32 0.00390625, %v368_v21  ;;  %v2398_v8 = vld [vmem:[#allocation5 + $0xb4] ss:$8 sps:$4 sm:$0xff]   ;;  %v3271_v55 = vsub.f32 %v3047_v24, %v444_v4  ;;  %v3277_v21 = vld [vmem:[%s2972_s30 + $0x1a0] sm:$0xff]  ;;  %4132 = vst [vmem:[#allocation23_spill] sm:$0xff] %v3294_v23 }
  0xf9   : > { %v611_v30 = vadd.f32 %v543_v54, %v542_v49  ;;  %v547_v54 = vmul.f32 %v3250_v18, %v3250_v18 }
  0xfa   : > { %606 = vadd.xlane.f32.xlu1 %v605_v13  ;;  %v2395_v13 = vld [vmem:[#allocation5 + $0xc4] ss:$8 sps:$4 sm:$0xff]   ;;  %4129 = vst [vmem:[#allocation20_spill] sm:$0xff] %v3271_v55  ;;  %v3286_v24 = vsub.f32 %v3056_v27, %v445_v17 }
  0xfb   : > { %406 = vadd.xlane.f32.xlu0 %v405_v12  ;;  %v3247_v12 = vsub.f32 %v3037_v20, %v443_v48  ;;  %v545_v20 = vmul.f32 %v3238_v58, %v3238_v58  ;;  %v2397_v48 = vld [vmem:[#allocation5 + $0xc0] ss:$8 sps:$4 sm:$0xff]   ;;  %1110 = vmatprep.subr.bf16.mxu0 %v2395_v13  ;;  %v3274_v13 = vsub.f32 %v3050_v25, %v444_v4  ;;  %v374_v18 = vpop.xlane.xlu1 %373  ;;  %v2401_v27 = vld [vmem:[#allocation5 + $0xa4] ss:$8 sps:$4 sm:$0xff]  }
  0xfc   : > { %1111 = vmatpush2.bf16.msra.mxu0 %v2397_v48  ;;  %v3280_v58 = vld [vmem:[%s2972_s30 + $0x1a8] sm:$0xff] }
  0xfd   : > { %4127 = vst [vmem:[#allocation18_spill] sm:$0xff] %v3247_v12  ;;  %v546_v49 = vmul.f32 %v3247_v12, %v3247_v12  ;;  %4130 = vst [vmem:[#allocation21_spill] sm:$0xff] %v3274_v13  ;;  %v614_v48 = vadd.f32 %v545_v20, %v544_v9  ;;  %v2400_v12 = vld [vmem:[#allocation5 + $0xb0] ss:$8 sps:$4 sm:$0xff]   ;;  %1112 = vmatprep.subr.bf16.mxu0 %v2398_v8  ;;  %v417_v25 = vadd.f32 %v3280_v58, %v3277_v21 }
  0xfe   : > { %409 = vadd.xlane.f32.xlu1 %v408_v37  ;;  %v414_v37 = vadd.f32 %v3258_v61, %v3255_v14  ;;  %v3291_v20 = vld [vmem:[%s2972_s30 + $0x1b0] sm:$0xff] }
  0xff   : > { %609 = vadd.xlane.f32.xlu0 %v608_v11  ;;  %v371_v11 = vpop.xlane.xlu0 %370  ;;  %v617_v4 = vadd.f32 %v547_v54, %v546_v49  ;;  %v380_v8 = vpop.xlane.xlu1 %379  ;;  %v447_v49 = vmul.f32 0.00390625, %v374_v18  ;;  %v2404_v18 = vld [vmem:[#allocation5 + $0x94] ss:$8 sps:$4 sm:$0xff]  }
 0x100   : > { %1113 = vmatpush2.bf16.msra.mxu0 %v2400_v12  ;;  %v446_v9 = vmul.f32 0.00390625, %v371_v11  ;;  %v548_v12 = vmul.f32 %v3271_v55, %v3271_v55  ;;  %v551_v11 = vmul.f32 %v3286_v24, %v3286_v24 }
 0x101   : > { %1114 = vmatprep.subr.bf16.mxu0 %v2401_v27 }
 0x102   : > { %612 = vadd.xlane.f32.xlu1 %v611_v30  ;;  %v3283_v30 = vsub.f32 %v3053_v26, %v445_v17  ;;  %v549_v26 = vmul.f32 %v3274_v13, %v3274_v13  ;;  %v2403_v17 = vld [vmem:[#allocation5 + $0xa0] ss:$8 sps:$4 sm:$0xff]   ;;  %v3310_v55 = vsub.f32 %v3062_v29, %v446_v9 }
 0x103   : > { %412 = vadd.xlane.f32.xlu0 %v411_v19  ;;  %v377_v19 = vpop.xlane.xlu0 %376  ;;  %v3313_v13 = vld [vmem:[%s2972_s30 + $0x1c0] sm:$0xff] }
 0x104   : > { %4131 = vst [vmem:[#allocation22_spill] sm:$0xff] %v3283_v30  ;;  %v550_v54 = vmul.f32 %v3283_v30, %v3283_v30  ;;  %1115 = vmatpush2.bf16.msra.mxu0 %v2403_v17  ;;  %v620_v27 = vadd.f32 %v549_v26, %v548_v12  ;;  %v423_v29 = vadd.f32 %v3316_v3, %v3313_v13  ;;  %v386_v17 = vpop.xlane.xlu1 %385 }
 0x105   : > { %1116 = vmatprep.subr.bf16.mxu0 %v2404_v18  ;;  %v553_v26 = vmul.f32 %v3310_v55, %v3310_v55  ;;  %v3331_v18 = vld [vmem:[%s2972_s30 + $0x1d0] sm:$0xff] }
 0x106   : > { %415 = vadd.xlane.f32.xlu1 %v414_v37  ;;  %v420_v37 = vadd.f32 %v3294_v23, %v3291_v20  ;;  %v2406_v23 = vld [vmem:[#allocation5 + $0x90] ss:$8 sps:$4 sm:$0xff]  }
 0x107   : > { %615 = vadd.xlane.f32.xlu0 %v614_v48  ;;  %v3307_v48 = vsub.f32 %v3059_v28, %v446_v9  ;;  %v383_v30 = vpop.xlane.xlu0 %382  ;;  %v3322_v28 = vsub.f32 %v3070_v32, %v447_v49  ;;  %v623_v9 = vadd.f32 %v551_v11, %v550_v54  ;;  %v3334_v32 = vld [vmem:[%s2972_s30 + $0x1d8] sm:$0xff] }
 0x108   : > { %1117 = vmatpush2.bf16.msra.mxu0 %v2406_v23 }
 0x109   : > { %4133 = vst [vmem:[#allocation24_spill] sm:$0xff] %v3307_v48  ;;  %4135 = vst [vmem:[#allocation26_spill] sm:$0xff] %v3322_v28  ;;  %v552_v12 = vmul.f32 %v3307_v48, %v3307_v48  ;;  %v555_v54 = vmul.f32 %v3322_v28, %v3322_v28  ;;  %v3349_v48 = vld [vmem:[%s2972_s30 + $0x1e0] sm:$0xff] }
 0x10a   : > { %618 = vadd.xlane.f32.xlu1 %v617_v4  ;;  %v3319_v4 = vsub.f32 %v3067_v31, %v447_v49  ;;  %v2407_v31 = vld [vmem:[#allocation5 + $0x84] ss:$8 sps:$4 sm:$0xff]   ;;  %v449_v49 = vmul.f32 0.00390625, %v380_v8  ;;  %v426_v8 = vadd.f32 %v3334_v32, %v3331_v18 }
 0x10b   : > { %418 = vadd.xlane.f32.xlu0 %v417_v25  ;;  %v448_v25 = vmul.f32 0.00390625, %v377_v19  ;;  %v2409_v19 = vld [vmem:[#allocation5 + $0x80] ss:$8 sps:$4 sm:$0xff]   ;;  %1118 = vmatprep.subr.bf16.mxu0 %v2407_v31  ;;  %v389_v11 = vpop.xlane.xlu0 %388  ;;  %v626_v31 = vadd.f32 %v553_v26, %v552_v12 }
 0x10c   : > { %4134 = vst [vmem:[#allocation25_spill] sm:$0xff] %v3319_v4  ;;  %1119 = vmatpush2.bf16.msra.mxu0 %v2409_v19  ;;  %v3355_v28 = vsub.f32 %v3085_v38, %v449_v49  ;;  %v452_v12 = vmul.f32 0.00390625, %v389_v11 }
 0x10d   : > { %v3337_v23 = vsub.f32 %v3075_v34, %v448_v25  ;;  %v450_v34 = vmul.f32 0.00390625, %v383_v30 }
 0x10e   : > { %421 = vadd.xlane.f32.xlu1 %v420_v37  ;;  %v554_v37 = vmul.f32 %v3319_v4, %v3319_v4  ;;  %v3352_v4 = vld [vmem:[%s2972_s30 + $0x1e8] sm:$0xff]  ;;  %4137 = vst [vmem:[#allocation28_spill] sm:$0xff] %v3355_v28 }
 0x10f   : > { %621 = vadd.xlane.f32.xlu0 %v620_v27  ;;  %4136 = vst [vmem:[#allocation27_spill] sm:$0xff] %v3337_v23  ;;  %v3344_v27 = vsub.f32 %v3078_v35, %v448_v25  ;;  %v392_v35 = vpop.xlane.xlu1 %391  ;;  %v429_v19 = vadd.f32 %v3352_v4, %v3349_v48  ;;  %v556_v30 = vmul.f32 %v3337_v23, %v3337_v23 }
 0x110   : > { %v629_v25 = vadd.f32 %v555_v54, %v554_v37  ;;  %v3365_v26 = vsub.f32 %v3091_v40, %v450_v34  ;;  %v3368_v38 = vsub.f32 %v3094_v41, %v450_v34  ;;  %v395_v37 = vpop.xlane.xlu0 %394  ;;  %v558_v54 = vmul.f32 %v3355_v28, %v3355_v28 }
 0x111   : > { %v3392_v34 = vsub.f32 %v3110_v47, %v452_v12  ;;  %v454_v28 = vmul.f32 0.00390625, %v395_v37 }
 0x112   : > { %624 = vadd.xlane.f32.xlu1 %v623_v9  ;;  %v3358_v9 = vsub.f32 %v3088_v39, %v449_v49  ;;  %v3371_v39 = vld [vmem:[%s2972_s30 + $0x1f0] sm:$0xff]  ;;  %v557_v49 = vmul.f32 %v3344_v27, %v3344_v27 }
 0x113   : > { %424 = vadd.xlane.f32.xlu0 %v423_v29  ;;  %v451_v29 = vmul.f32 0.00390625, %v386_v17  ;;  %v3374_v17 = vld [vmem:[%s2972_s30 + $0x1f8] sm:$0xff]  ;;  %v3418_v37 = vsub.f32 %v3126_v53, %v454_v28 }
 0x114   : > { %4138 = vst [vmem:[#allocation29_spill] sm:$0xff] %v3358_v9  ;;  %v559_v41 = vmul.f32 %v3358_v9, %v3358_v9  ;;  %v432_v23 = vadd.f32 %v3374_v17, %v3371_v39 }
 0x115   : > { %v3381_v11 = vsub.f32 %v3099_v43, %v451_v29  ;;  %v3384_v40 = vsub.f32 %v3102_v44, %v451_v29  ;;  %v632_v43 = vadd.f32 %v557_v49, %v556_v30  ;;  %v560_v44 = vmul.f32 %v3365_v26, %v3365_v26 }
 0x116   : > { %427 = vadd.xlane.f32.xlu1 %v426_v8  ;;  %v453_v8 = vmul.f32 0.00390625, %v392_v35  ;;  %v561_v29 = vmul.f32 %v3368_v38, %v3368_v38  ;;  %v398_v35 = vpop.xlane.xlu1 %397  ;;  %v635_v9 = vadd.f32 %v559_v41, %v558_v54  ;;  %v565_v49 = vmul.f32 %v3392_v34, %v3392_v34 }
 0x117   : > { %627 = vadd.xlane.f32.xlu0 %v626_v31  ;;  %v3389_v31 = vsub.f32 %v3107_v46, %v452_v12  ;;  %v562_v47 = vmul.f32 %v3381_v11, %v3381_v11  ;;  %v455_v12 = vmul.f32 0.00390625, %v398_v35 }
 0x118   : > { %v3401_v46 = vsub.f32 %v3117_v50, %v453_v8  ;;  %v3415_v50 = vsub.f32 %v3123_v52, %v454_v28  ;;  %v638_v54 = vadd.f32 %v561_v29, %v560_v44  ;;  %v569_v28 = vmul.f32 %v3418_v37, %v3418_v37 }
 0x119   : > { %4139 = vst [vmem:[#allocation30_spill] sm:$0xff] %v3389_v31  ;;  %v564_v30 = vmul.f32 %v3389_v31, %v3389_v31  ;;  %v3428_v52 = vsub.f32 %v3136_v57, %v455_v12 }
 0x11a   : > { %630 = vadd.xlane.f32.xlu1 %v629_v25  ;;  %v563_v25 = vmul.f32 %v3384_v40, %v3384_v40  ;;  %v566_v35 = vmul.f32 %v3401_v46, %v3401_v46  ;;  %v568_v53 = vmul.f32 %v3415_v50, %v3415_v50 }
 0x11b   : > { %430 = vadd.xlane.f32.xlu0 %v429_v19  ;;  %v3408_v19 = vsub.f32 %v3120_v51, %v453_v8  ;;  %v3421_v51 = vsub.f32 %v3133_v56, %v455_v12  ;;  %v644_v8 = vadd.f32 %v565_v49, %v564_v30 }
 0x11c   : > { %v641_v41 = vadd.f32 %v563_v25, %v562_v47 }
 0x11d   : > { %v567_v31 = vmul.f32 %v3408_v19, %v3408_v19 }
 0x11e   : > { %433 = vadd.xlane.f32.xlu1 %v432_v23  ;;  %v650_v23 = vadd.f32 %v569_v28, %v568_v53 }
 0x11f   : > { %633 = vadd.xlane.f32.xlu0 %v632_v43  ;;  %v647_v56 = vadd.f32 %v567_v31, %v566_v35  ;;  %v570_v43 = vmul.f32 %v3421_v51, %v3421_v51 }
 0x122   : > { %636 = vadd.xlane.f32.xlu1 %v635_v9  ;;  %v571_v9 = vmul.f32 %v3428_v52, %v3428_v52 }
 0x123   : > { %639 = vadd.xlane.f32.xlu0 %v638_v54 }
 0x124   : > { %v653_v57 = vadd.f32 %v571_v9, %v570_v43 }
 0x126   : > { %642 = vadd.xlane.f32.xlu1 %v641_v41 }
 0x127   : > { %645 = vadd.xlane.f32.xlu0 %v644_v8 }
 0x12a   : > { %648 = vadd.xlane.f32.xlu1 %v647_v56 }
 0x12b   : > { %651 = vadd.xlane.f32.xlu0 %v650_v23 }
 0x12e   : > { %654 = vadd.xlane.f32.xlu1 %v653_v57 }
 0x178   : > { %v598_v44 = vpop.xlane.xlu0 %597 }
 0x179   : > { %v692_v29 = vmul.f32 0.00390625, %v598_v44 }
 0x17b   : > { %v724_v47 = vadd.f32 1e-05, %v692_v29  ;;  %v601_v25 = vpop.xlane.xlu1 %600 }
 0x17c   : > { %v401_v12 = vpop.xlane.xlu0 %400  ;;  %v693_v30 = vmul.f32 0.00390625, %v601_v25 }
 0x17d   : > { %v456_v31 = vmul.f32 0.00390625, %v401_v12  ;;  %2458 = vrsqrt.f32 %v724_v47 }
 0x17e   : > { %v725_v49 = vadd.f32 1e-05, %v693_v30 }
 0x17f   : > { %v3439_v54 = vsub.f32 %v3159_v0, %v456_v31  ;;  %v3442_v41 = vsub.f32 %v3162_v1, %v456_v31  ;;  %v404_v8 = vpop.xlane.xlu1 %403 }
 0x180   : > { %v604_v35 = vpop.xlane.xlu0 %603  ;;  %2460 = vrsqrt.f32 %v725_v49  ;;  %v457_v53 = vmul.f32 0.00390625, %v404_v8 }
 0x181   : > { %v694_v28 = vmul.f32 0.00390625, %v604_v35  ;;  %v572_v56 = vmul.f32 %v3439_v54, %v3439_v54  ;;  %v573_v23 = vmul.f32 %v3442_v41, %v3442_v41 }
 0x182   : > { %v3449_v43 = vsub.f32 %v3187_v42, %v457_v53  ;;  %v3452_v0 = vsub.f32 %v3190_v45, %v457_v53 }
 0x183   : > { %v726_v9 = vadd.f32 1e-05, %v694_v28  ;;  %v607_v1 = vpop.xlane.xlu1 %606  ;;  %v656_v44 = vadd.f32 %v573_v23, %v572_v56 }
 0x184   : > { %v407_v57 = vpop.xlane.xlu0 %406  ;;  %v695_v29 = vmul.f32 0.00390625, %v607_v1  ;;  %v574_v25 = vmul.f32 %v3449_v43, %v3449_v43  ;;  %v575_v12 = vmul.f32 %v3452_v0, %v3452_v0 }
 0x185   : > { %v458_v47 = vmul.f32 0.00390625, %v407_v57  ;;  %2462 = vrsqrt.f32 %v726_v9  ;;  %657 = vadd.xlane.f32.xlu0 %v656_v44 }
 0x186   : > { %v727_v30 = vadd.f32 1e-05, %v695_v29  ;;  %v659_v8 = vadd.f32 %v575_v12, %v574_v25 }
 0x187   : > { %v3459_v42 = vsub.f32 %v3203_v7, %v458_v47  ;;  %v3462_v45 = vsub.f32 %v3206_v10, %v458_v47  ;;  %v410_v31 = vpop.xlane.xlu1 %409 }
 0x188   : > { %v610_v49 = vpop.xlane.xlu0 %609  ;;  %2464 = vrsqrt.f32 %v727_v30  ;;  %v459_v35 = vmul.f32 0.00390625, %v410_v31  ;;  %660 = vadd.xlane.f32.xlu1 %v659_v8 }
 0x189   : > { %v696_v53 = vmul.f32 0.00390625, %v610_v49  ;;  %v576_v28 = vmul.f32 %v3459_v42, %v3459_v42  ;;  %v577_v56 = vmul.f32 %v3462_v45, %v3462_v45 }
 0x18a   : > { %v2459_v23 = vpop.eup %2458  ;;  %v3469_v7 = vsub.f32 %v3219_v33, %v459_v35  ;;  %v3472_v10 = vsub.f32 %v3222_v36, %v459_v35 }
 0x18b   : > { %v728_v9 = vadd.f32 1e-05, %v696_v53  ;;  %v613_v1 = vpop.xlane.xlu1 %612  ;;  %v662_v44 = vadd.f32 %v577_v56, %v576_v28  ;;  %v789_v33 = vmul.f32 %v2459_v23, %v3146_v60  ;;  %v788_v56 = vmul.f32 %v2459_v23, %v3143_v59 }
 0x18c   : > { %v413_v57 = vpop.xlane.xlu0 %412  ;;  %v697_v29 = vmul.f32 0.00390625, %v613_v1  ;;  %v578_v25 = vmul.f32 %v3469_v7, %v3469_v7  ;;  %v579_v30 = vmul.f32 %v3472_v10, %v3472_v10 }
 0x18d   : > { %v460_v47 = vmul.f32 0.00390625, %v413_v57  ;;  %v2461_v12 = vpop.eup %2460  ;;  %2466 = vrsqrt.f32 %v728_v9  ;;  %663 = vadd.xlane.f32.xlu0 %v662_v44 }
 0x18e   : > { %v729_v31 = vadd.f32 1e-05, %v697_v29  ;;  %v791_v8 = vmul.f32 %v2461_v12, %v3168_v6  ;;  %v665_v28 = vadd.f32 %v579_v30, %v578_v25  ;;  %v790_v9 = vmul.f32 %v2461_v12, %v3165_v5 }
 0x18f   : > { %v3480_v36 = vsub.f32 %v3241_v16, %v460_v47  ;;  %v3483_v49 = vsub.f32 %v3244_v15, %v460_v47  ;;  %v416_v35 = vpop.xlane.xlu1 %415 }
 0x190   : > { %v616_v53 = vpop.xlane.xlu0 %615  ;;  %2468 = vrsqrt.f32 %v729_v31  ;;  %v461_v1 = vmul.f32 0.00390625, %v416_v35  ;;  %v853_v60 = vpack.c.bf16 %v791_v8, %v789_v33  ;;  %666 = vadd.xlane.f32.xlu1 %v665_v28  ;;  %v852_v44 = vpack.c.bf16 %v790_v9, %v788_v56 }
 0x191   : > { %v698_v57 = vmul.f32 0.00390625, %v616_v53  ;;  %v580_v16 = vmul.f32 %v3480_v36, %v3480_v36  ;;  %v581_v15 = vmul.f32 %v3483_v49, %v3483_v49 }
 0x192   : > { %v2463_v6 = vpop.eup %2462  ;;  %v3493_v29 = vsub.f32 %v3255_v14, %v461_v1  ;;  %v3496_v59 = vsub.f32 %v3258_v61, %v461_v1  ;;  %1120 = vmatprep.mubr.bf16.mxu0 %v853_v60 }
 0x193   : > { %v730_v5 = vadd.f32 1e-05, %v698_v57  ;;  %v619_v23 = vpop.xlane.xlu1 %618  ;;  %1121 = vmatmul.mubr.bf16.vlgmr.msra.gmra.mxu0 %v852_v44  ;;  %v668_v25 = vadd.f32 %v581_v15, %v580_v16  ;;  %v793_v61 = vmul.f32 %v2463_v6, %v3152_v63  ;;  %v792_v57 = vmul.f32 %v2463_v6, %v3149_v62 }
 0x194   : > { %v419_v47 = vpop.xlane.xlu0 %418  ;;  %v699_v12 = vmul.f32 0.00390625, %v619_v23  ;;  %v582_v33 = vmul.f32 %v3493_v29, %v3493_v29  ;;  %v583_v14 = vmul.f32 %v3496_v59, %v3496_v59  ;;  %v4140_v23 = vld [vmem:[#allocation23_spill] sm:$0xff] }
 0x195   : > { %v462_v30 = vmul.f32 0.00390625, %v419_v47  ;;  %v2465_v31 = vpop.eup %2464  ;;  %2470 = vrsqrt.f32 %v730_v5  ;;  %669 = vadd.xlane.f32.xlu0 %v668_v25 }
 0x196   : > { %v731_v8 = vadd.f32 1e-05, %v699_v12  ;;  %v795_v28 = vmul.f32 %v2465_v31, %v3180_v2  ;;  %v671_v1 = vadd.f32 %v583_v14, %v582_v33  ;;  %v794_v60 = vmul.f32 %v2465_v31, %v3171_v22  ;;  %v4141_v14 = vld [vmem:[#allocation13_spill] sm:$0xff] }
 0x197   : > { %v3504_v35 = vsub.f32 %v3277_v21, %v462_v30  ;;  %v3507_v53 = vsub.f32 %v3280_v58, %v462_v30  ;;  %v422_v56 = vpop.xlane.xlu1 %421 }
 0x198   : > { %v622_v9 = vpop.xlane.xlu0 %621  ;;  %2472 = vrsqrt.f32 %v731_v8  ;;  %v463_v44 = vmul.f32 0.00390625, %v422_v56  ;;  %v855_v63 = vpack.c.bf16 %v795_v28, %v793_v61  ;;  %672 = vadd.xlane.f32.xlu1 %v671_v1  ;;  %v854_v15 = vpack.c.bf16 %v794_v60, %v792_v57 }
 0x199   : > { %v700_v16 = vmul.f32 0.00390625, %v622_v9  ;;  %v584_v21 = vmul.f32 %v3504_v35, %v3504_v35  ;;  %v585_v58 = vmul.f32 %v3507_v53, %v3507_v53  ;;  %v4142_v9 = vld [vmem:[#allocation15_spill] sm:$0xff] }
 0x19a   : > { %v2467_v2 = vpop.eup %2466  ;;  %v3517_v5 = vsub.f32 %v3291_v20, %v463_v44  ;;  %v3520_v62 = vsub.f32 %v4140_v23, %v463_v44  ;;  %1130 = vmatprep.mubr.bf16.mxu0 %v855_v63 }
 0x19b   : > { %v732_v22 = vadd.f32 1e-05, %v700_v16  ;;  %v625_v6 = vpop.xlane.xlu1 %624  ;;  %1131 = vmatmul.mubr.bf16.gmra.mxu0 %v854_v15  ;;  %v674_v25 = vadd.f32 %v585_v58, %v584_v21  ;;  %v797_v61 = vmul.f32 %v2467_v2, %v4141_v14  ;;  %v4143_v16 = vld [vmem:[#allocation12_spill] sm:$0xff]  ;;  %v4144_v15 = vld [vmem:[#allocation14_spill] sm:$0xff] }
 0x19c   : > { %v425_v47 = vpop.xlane.xlu0 %424  ;;  %v701_v12 = vmul.f32 0.00390625, %v625_v6  ;;  %v586_v33 = vmul.f32 %v3517_v5, %v3517_v5  ;;  %v587_v20 = vmul.f32 %v3520_v62, %v3520_v62  ;;  %v796_v63 = vmul.f32 %v2467_v2, %v4143_v16 }
 0x19d   : > { %v464_v30 = vmul.f32 0.00390625, %v425_v47  ;;  %v2469_v31 = vpop.eup %2468  ;;  %2474 = vrsqrt.f32 %v732_v22  ;;  %675 = vadd.xlane.f32.xlu0 %v674_v25 }
 0x19e   : > { %v733_v8 = vadd.f32 1e-05, %v701_v12  ;;  %v799_v1 = vmul.f32 %v2469_v31, %v4142_v9  ;;  %v677_v44 = vadd.f32 %v587_v20, %v586_v33  ;;  %v798_v21 = vmul.f32 %v2469_v31, %v4144_v15  ;;  %v4145_v9 = vld [vmem:[#allocation17_spill] sm:$0xff] }
 0x19f   : > { %v3528_v28 = vsub.f32 %v3313_v13, %v464_v30  ;;  %v3531_v56 = vsub.f32 %v3316_v3, %v464_v30  ;;  %v428_v57 = vpop.xlane.xlu1 %427 }
 0x1a0   : > { %v628_v60 = vpop.xlane.xlu0 %627  ;;  %2476 = vrsqrt.f32 %v733_v8  ;;  %v465_v58 = vmul.f32 0.00390625, %v428_v57  ;;  %v857_v22 = vpack.c.bf16 %v799_v1, %v797_v61  ;;  %678 = vadd.xlane.f32.xlu1 %v677_v44  ;;  %v856_v6 = vpack.c.bf16 %v798_v21, %v796_v63  ;;  %v4146_v44 = vld [vmem:[#allocation19_spill] sm:$0xff] }
 0x1a1   : > { %v702_v23 = vmul.f32 0.00390625, %v628_v60  ;;  %v588_v13 = vmul.f32 %v3528_v28, %v3528_v28  ;;  %v589_v3 = vmul.f32 %v3531_v56, %v3531_v56 }
 0x1a2   : > { %v2471_v47 = vpop.eup %2470  ;;  %v3541_v25 = vsub.f32 %v3331_v18, %v465_v58  ;;  %v3544_v2 = vsub.f32 %v3334_v32, %v465_v58  ;;  %1140 = vmatprep.mubr.bf16.mxu0 %v857_v22  ;;  %v4147_v58 = vld [vmem:[#allocation16_spill] sm:$0xff]  ;;  %v4148_v22 = vld [vmem:[#allocation18_spill] sm:$0xff] }
 0x1a3   : > { %v734_v12 = vadd.f32 1e-05, %v702_v23  ;;  %v631_v30 = vpop.xlane.xlu1 %630  ;;  %1141 = vmatmul.mubr.bf16.gmra.mxu0 %v856_v6  ;;  %v680_v31 = vadd.f32 %v589_v3, %v588_v13  ;;  %v801_v32 = vmul.f32 %v2471_v47, %v4145_v9  ;;  %v800_v23 = vmul.f32 %v2471_v47, %v4147_v58 }
 0x1a4   : > { %v431_v33 = vpop.xlane.xlu0 %430  ;;  %v703_v20 = vmul.f32 0.00390625, %v631_v30  ;;  %v590_v61 = vmul.f32 %v3541_v25, %v3541_v25  ;;  %v591_v18 = vmul.f32 %v3544_v2, %v3544_v2 }
 0x1a5   : > { %v466_v14 = vmul.f32 0.00390625, %v431_v33  ;;  %v2473_v8 = vpop.eup %2472  ;;  %2478 = vrsqrt.f32 %v734_v12  ;;  %681 = vadd.xlane.f32.xlu0 %v680_v31 }
 0x1a6   : > { %v735_v1 = vadd.f32 1e-05, %v703_v20  ;;  %v803_v16 = vmul.f32 %v2473_v8, %v4146_v44  ;;  %v683_v21 = vadd.f32 %v591_v18, %v590_v61  ;;  %v802_v6 = vmul.f32 %v2473_v8, %v4148_v22  ;;  %v4149_v44 = vld [vmem:[#allocation21_spill] sm:$0xff] }
 0x1a7   : > { %v3552_v57 = vsub.f32 %v3349_v48, %v466_v14  ;;  %v3555_v60 = vsub.f32 %v3352_v4, %v466_v14  ;;  %v434_v63 = vpop.xlane.xlu1 %433 }
 0x1a8   : > { %v634_v15 = vpop.xlane.xlu0 %633  ;;  %2480 = vrsqrt.f32 %v735_v1  ;;  %v467_v13 = vmul.f32 0.00390625, %v434_v63  ;;  %v859_v12 = vpack.c.bf16 %v803_v16, %v801_v32  ;;  %684 = vadd.xlane.f32.xlu1 %v683_v21  ;;  %v858_v30 = vpack.c.bf16 %v802_v6, %v800_v23  ;;  %v4150_v21 = vld [vmem:[#allocation22_spill] sm:$0xff] }
 0x1a9   : > { %v704_v3 = vmul.f32 0.00390625, %v634_v15  ;;  %v592_v48 = vmul.f32 %v3552_v57, %v3552_v57  ;;  %v593_v4 = vmul.f32 %v3555_v60, %v3555_v60 }
 0x1aa   : > { %v2475_v33 = vpop.eup %2474  ;;  %v3565_v31 = vsub.f32 %v3371_v39, %v467_v13  ;;  %v3568_v47 = vsub.f32 %v3374_v17, %v467_v13  ;;  %1150 = vmatprep.mubr.bf16.mxu0 %v859_v12  ;;  %v4151_v13 = vld [vmem:[#allocation20_spill] sm:$0xff] }
 0x1ab   : > { %v736_v20 = vadd.f32 1e-05, %v704_v3  ;;  %v637_v14 = vpop.xlane.xlu1 %636  ;;  %1151 = vmatmul.mubr.bf16.gmra.mxu0 %v858_v30  ;;  %v686_v8 = vadd.f32 %v593_v4, %v592_v48  ;;  %v805_v17 = vmul.f32 %v2475_v33, %v4149_v44  ;;  %v804_v3 = vmul.f32 %v2475_v33, %v4151_v13  ;;  %v4152_v44 = vld [vmem:[#allocation26_spill] sm:$0xff] }
 0x1ac   : > { %v640_v61 = vpop.xlane.xlu0 %639  ;;  %v705_v18 = vmul.f32 0.00390625, %v637_v14  ;;  %v594_v32 = vmul.f32 %v3565_v31, %v3565_v31  ;;  %v595_v39 = vmul.f32 %v3568_v47, %v3568_v47 }
 0x1ad   : > { %v706_v9 = vmul.f32 0.00390625, %v640_v61  ;;  %v2477_v1 = vpop.eup %2476  ;;  %2482 = vrsqrt.f32 %v736_v20  ;;  %687 = vadd.xlane.f32.xlu0 %v686_v8  ;;  %v2410_v61 = vld [vmem:[#allocation7 + $0x74] ss:$8 sps:$4 sm:$0xff]  }
 0x1ae   : > { %v737_v16 = vadd.f32 1e-05, %v705_v18  ;;  %v807_v15 = vmul.f32 %v2477_v1, %v3286_v24  ;;  %v806_v58 = vmul.f32 %v2477_v1, %v4150_v21  ;;  %v689_v6 = vadd.f32 %v595_v39, %v594_v32  ;;  %v2412_v18 = vld [vmem:[#allocation7 + $0x70] ss:$8 sps:$4 sm:$0xff]   ;;  %1837 = vmatprep.subr.bf16.mxu1 %v2410_v61 }
 0x1af   : > { %v738_v63 = vadd.f32 1e-05, %v706_v9  ;;  %v643_v23 = vpop.xlane.xlu1 %642  ;;  %1838 = vmatpush1.bf16.msra.mxu1 %v2412_v18  ;;  %v4156_v18 = vld [vmem:[#allocation27_spill] sm:$0xff] }
 0x1b0   : > { %v646_v22 = vpop.xlane.xlu0 %645  ;;  %2484 = vrsqrt.f32 %v737_v16  ;;  %v707_v12 = vmul.f32 0.00390625, %v643_v23  ;;  %v861_v48 = vpack.c.bf16 %v807_v15, %v805_v17  ;;  %690 = vadd.xlane.f32.xlu1 %v689_v6  ;;  %v860_v4 = vpack.c.bf16 %v806_v58, %v804_v3  ;;  %v4153_v16 = vld [vmem:[#allocation24_spill] sm:$0xff]  ;;  %v4154_v15 = vld [vmem:[#allocation25_spill] sm:$0xff] }
 0x1b1   : > { %v708_v30 = vmul.f32 0.00390625, %v646_v22  ;;  %2486 = vrsqrt.f32 %v738_v63  ;;  %v2413_v58 = vld [vmem:[#allocation7 + $0x64] ss:$8 sps:$4 sm:$0xff]   ;;  %v2415_v6 = vld [vmem:[#allocation7 + $0x60] ss:$8 sps:$4 sm:$0xff]  }
 0x1b2   : > { %v2479_v20 = vpop.eup %2478  ;;  %v739_v14 = vadd.f32 1e-05, %v707_v12  ;;  %1160 = vmatprep.mubr.bf16.mxu0 %v861_v48  ;;  %1839 = vmatprep.subr.bf16.mxu1 %v2413_v58  ;;  %v2416_v48 = vld [vmem:[#allocation7 + $0x54] ss:$8 sps:$4 sm:$0xff]   ;;  %v2424_v58 = vld [vmem:[#allocation7 + $0x30] ss:$8 sps:$4 sm:$0xff]  }
 0x1b3   : > { %v740_v8 = vadd.f32 1e-05, %v708_v30  ;;  %v649_v24 = vpop.xlane.xlu1 %648  ;;  %1161 = vmatmul.mubr.bf16.gmra.mxu0 %v860_v4  ;;  %v809_v1 = vmul.f32 %v2479_v20, %v3310_v55  ;;  %v808_v63 = vmul.f32 %v2479_v20, %v4153_v16  ;;  %1840 = vmatpush1.bf16.msra.mxu1 %v2415_v6  ;;  %v2418_v4 = vld [vmem:[#allocation7 + $0x50] ss:$8 sps:$4 sm:$0xff]  }
 0x1b4   : > { %2488 = vrsqrt.f32 %v739_v14  ;;  %v709_v9 = vmul.f32 0.00390625, %v649_v24  ;;  %v652_v32 = vpop.xlane.xlu0 %651  ;;  %1841 = vmatprep.subr.bf16.mxu1 %v2416_v48 }
 0x1b5   : > { %v2481_v33 = vpop.eup %2480  ;;  %2490 = vrsqrt.f32 %v740_v8  ;;  %v710_v23 = vmul.f32 0.00390625, %v652_v32  ;;  %v4155_v8 = vld [vmem:[#allocation29_spill] sm:$0xff]  ;;  %v4157_v32 = vld [vmem:[#allocation28_spill] sm:$0xff] }
 0x1b6   : > { %v741_v39 = vadd.f32 1e-05, %v709_v9  ;;  %v811_v17 = vmul.f32 %v2481_v33, %v4152_v44  ;;  %v810_v21 = vmul.f32 %v2481_v33, %v4154_v15  ;;  %v2421_v44 = vld [vmem:[#allocation7 + $0x40] ss:$8 sps:$4 sm:$0xff]  }
 0x1b7   : > { %v655_v22 = vpop.xlane.xlu1 %654  ;;  %v742_v20 = vadd.f32 1e-05, %v710_v23  ;;  %1842 = vmatpush1.bf16.msra.mxu1 %v2418_v4  ;;  %v2425_v23 = vld [vmem:[#allocation7 + $0x24] ss:$8 sps:$4 sm:$0xff]   ;;  %v2428_v4 = vld [vmem:[#allocation7 + $0x14] ss:$8 sps:$4 sm:$0xff]  }
 0x1b8   : > { %2492 = vrsqrt.f32 %v741_v39  ;;  %v711_v13 = vmul.f32 0.00390625, %v655_v22  ;;  %v863_v3 = vpack.c.bf16 %v811_v17, %v809_v1  ;;  %v862_v12 = vpack.c.bf16 %v810_v21, %v808_v63  ;;  %v2419_v1 = vld [vmem:[#allocation7 + $0x44] ss:$8 sps:$4 sm:$0xff]   ;;  %v2422_v21 = vld [vmem:[#allocation7 + $0x34] ss:$8 sps:$4 sm:$0xff]  }
 0x1b9   : > { %1843 = vmatprep.subr.bf16.mxu1 %v2419_v1  ;;  %v2436_v1 = vld [vmem:[#allocation7 + $0xf0] ss:$8 sps:$4 sm:$0xff]  }
 0x1ba   : > { %v2483_v55 = vpop.eup %2482  ;;  %v743_v30 = vadd.f32 1e-05, %v711_v13  ;;  %1170 = vmatprep.mubr.bf16.mxu0 %v863_v3 }
 0x1bb   : > { %1171 = vmatmul.mubr.bf16.gmra.mxu0 %v862_v12  ;;  %v813_v61 = vmul.f32 %v2483_v55, %v3344_v27  ;;  %v812_v9 = vmul.f32 %v2483_v55, %v4156_v18  ;;  %1844 = vmatpush1.bf16.msra.mxu1 %v2421_v44  ;;  %v2439_v44 = vld [vmem:[#allocation7 + $0xe0] ss:$8 sps:$4 sm:$0xff]  }
 0x1bc   : > { %2494 = vrsqrt.f32 %v743_v30  ;;  %1845 = vmatprep.subr.bf16.mxu1 %v2422_v21  ;;  %v2448_v21 = vld [vmem:[#allocation7 + $0xb0] ss:$8 sps:$4 sm:$0xff]  }
 0x1bd   : > { %v2485_v14 = vpop.eup %2484  ;;  %2496 = vrsqrt.f32 %v742_v20  ;;  %v2430_v20 = vld [vmem:[#allocation7 + $0x10] ss:$8 sps:$4 sm:$0xff]  }
 0x1be   : > { %v815_v24 = vmul.f32 %v2485_v14, %v4155_v8  ;;  %v814_v33 = vmul.f32 %v2485_v14, %v4157_v32  ;;  %v2487_v39 = vpop.eup %2486  ;;  %v2431_v14 = vld [vmem:[#allocation7 + $0x4] ss:$8 sps:$4 sm:$0xff]  }
 0x1bf   : > { %v817_v27 = vmul.f32 %v2487_v39, %v3368_v38  ;;  %1846 = vmatpush1.bf16.msra.mxu1 %v2424_v58  ;;  %v816_v55 = vmul.f32 %v2487_v39, %v3365_v26  ;;  %v2427_v38 = vld [vmem:[#allocation7 + $0x20] ss:$8 sps:$4 sm:$0xff]   ;;  %v4158_v26 = vld [vmem:[#allocation30_spill] sm:$0xff] }
 0x1c0   : > { %v865_v17 = vpack.c.bf16 %v815_v24, %v813_v61  ;;  %v864_v16 = vpack.c.bf16 %v814_v33, %v812_v9  ;;  %1847 = vmatprep.subr.bf16.mxu1 %v2425_v23  ;;  %v2434_v33 = vld [vmem:[#allocation7 + $0xf4] ss:$8 sps:$4 sm:$0xff]   ;;  %v2451_v58 = vld [vmem:[#allocation7 + $0xa0] ss:$8 sps:$4 sm:$0xff]   ;;  %v2454_v23 = vld [vmem:[#allocation7 + $0x90] ss:$8 sps:$4 sm:$0xff]  }
 0x1c1   : > { %v2489_v63 = vpop.eup %2488 }
 0x1c2   : > { %1180 = vmatprep.mubr.bf16.mxu0 %v865_v17  ;;  %v819_v15 = vmul.f32 %v2489_v63, %v3384_v40  ;;  %v2491_v22 = vpop.eup %2490  ;;  %v818_v3 = vmul.f32 %v2489_v63, %v3381_v11  ;;  %v2443_v63 = vld [vmem:[#allocation7 + $0xc4] ss:$8 sps:$4 sm:$0xff]  }
 0x1c3   : > { %1181 = vmatmul.mubr.bf16.gmra.mxu0 %v864_v16  ;;  %v821_v40 = vmul.f32 %v2491_v22, %v3392_v34  ;;  %1848 = vmatpush1.bf16.msra.mxu1 %v2427_v38  ;;  %v820_v24 = vmul.f32 %v2491_v22, %v4158_v26  ;;  %v2433_v34 = vld [vmem:[#allocation7] ss:$8 sps:$4 sm:$0xff]   ;;  %v2440_v16 = vld [vmem:[#allocation7 + $0xd4] ss:$8 sps:$4 sm:$0xff]   ;;  %v2455_v22 = vld [vmem:[#allocation7 + $0x84] ss:$8 sps:$4 sm:$0xff]  }
 0x1c4   : > { %v867_v6 = vpack.c.bf16 %v819_v15, %v817_v27  ;;  %v866_v30 = vpack.c.bf16 %v818_v3, %v816_v55  ;;  %1849 = vmatprep.subr.bf16.mxu1 %v2428_v4  ;;  %v2445_v27 = vld [vmem:[#allocation7 + $0xc0] ss:$8 sps:$4 sm:$0xff]   ;;  %v2446_v15 = vld [vmem:[#allocation7 + $0xb4] ss:$8 sps:$4 sm:$0xff]  }
 0x1c5   : > { %v2493_v13 = vpop.eup %2492 }
 0x1c6   : > { %1190 = vmatprep.mubr.bf16.mxu0 %v867_v6  ;;  %v823_v12 = vmul.f32 %v2493_v13, %v3408_v19  ;;  %v822_v8 = vmul.f32 %v2493_v13, %v3401_v46  ;;  %v2437_v46 = vld [vmem:[#allocation7 + $0xe4] ss:$8 sps:$4 sm:$0xff]   ;;  %v2457_v6 = vld [vmem:[#allocation7 + $0x80] ss:$8 sps:$4 sm:$0xff]  }
 0x1c7   : > { %1850 = vmatpush1.bf16.msra.mxu1 %v2430_v20 }
 0x1c8   : > { %v869_v48 = vpack.c.bf16 %v823_v12, %v821_v40  ;;  %1851 = vmatprep.subr.bf16.mxu1 %v2431_v14  ;;  %v868_v9 = vpack.c.bf16 %v822_v8, %v820_v24 }
 0x1c9   : > { %v2495_v61 = vpop.eup %2494 }
 0x1ca   : > { %v2497_v11 = vpop.eup %2496  ;;  %v827_v19 = vmul.f32 %v2495_v61, %v3428_v52  ;;  %v826_v39 = vmul.f32 %v2495_v61, %v3421_v51  ;;  %v2449_v51 = vld [vmem:[#allocation7 + $0xa4] ss:$8 sps:$4 sm:$0xff]  }
 0x1cb   : > { %1191 = vmatmul.mubr.bf16.gmra.mxu0 %v866_v30  ;;  %v825_v18 = vmul.f32 %v2497_v11, %v3418_v37  ;;  %1852 = vmatpush1.bf16.msra.mxu1 %v2433_v34  ;;  %v824_v52 = vmul.f32 %v2497_v11, %v3415_v50  ;;  %v2442_v37 = vld [vmem:[#allocation7 + $0xd0] ss:$8 sps:$4 sm:$0xff]   ;;  %v2452_v50 = vld [vmem:[#allocation7 + $0x94] ss:$8 sps:$4 sm:$0xff]  }
 0x1cc   : > { %1200 = vmatprep.mubr.bf16.mxu0 %v869_v48  ;;  %1853 = vmatprep.subr.bf16.mxu1 %v2434_v33 }
 0x1cd   : > { %v871_v32 = vpack.c.bf16 %v827_v19, %v825_v18  ;;  %v870_v17 = vpack.c.bf16 %v826_v39, %v824_v52 }
 0x1cf   : > { %1854 = vmatpush2.bf16.msra.mxu1 %v2436_v1 }
 0x1d0   : > { %1855 = vmatprep.subr.bf16.mxu1 %v2437_v46 }
 0x1d3   : > { %1201 = vmatmul.mubr.bf16.gmra.mxu0 %v868_v9  ;;  %1856 = vmatpush2.bf16.msra.mxu1 %v2439_v44 }
 0x1d4   : > { %1210 = vmatprep.mubr.bf16.mxu0 %v871_v32  ;;  %1857 = vmatprep.subr.bf16.mxu1 %v2440_v16 }
 0x1d7   : > { %1858 = vmatpush2.bf16.msra.mxu1 %v2442_v37 }
 0x1d8   : > { %1859 = vmatprep.subr.bf16.mxu1 %v2443_v63 }
 0x1db   : > { %1211 = vmatmul.mubr.bf16.gmra.mxu0 %v870_v17  ;;  %1860 = vmatpush2.bf16.msra.mxu1 %v2445_v27 }
 0x1dc   : > { %1861 = vmatprep.subr.bf16.mxu1 %v2446_v15 }
 0x1df   : > { %1862 = vmatpush2.bf16.msra.mxu1 %v2448_v21 }
 0x1e0   : > { %1863 = vmatprep.subr.bf16.mxu1 %v2449_v51 }
 0x1e3   : > { %1864 = vmatpush2.bf16.msra.mxu1 %v2451_v58 }
 0x1e4   : > { %1865 = vmatprep.subr.bf16.mxu1 %v2452_v50 }
 0x1e7   : > { %1866 = vmatpush2.bf16.msra.mxu1 %v2454_v23 }
 0x1e8   : > { %1867 = vmatprep.subr.bf16.mxu1 %v2455_v22 }
 0x1eb   : > { %1868 = vmatpush2.bf16.msra.mxu1 %v2457_v6 }
 0x20e   : > { %v658_v13 = vpop.xlane.xlu0 %657 }
 0x20f   : > { %v712_v3 = vmul.f32 0.00390625, %v658_v13 }
 0x211   : > { %v744_v12 = vadd.f32 1e-05, %v712_v3  ;;  %v661_v55 = vpop.xlane.xlu1 %660 }
 0x212   : > { %v713_v38 = vmul.f32 0.00390625, %v661_v55 }
 0x213   : > { %2498 = vrsqrt.f32 %v744_v12 }
 0x214   : > { %v745_v40 = vadd.f32 1e-05, %v713_v38 }
 0x216   : > { %v664_v30 = vpop.xlane.xlu0 %663  ;;  %2500 = vrsqrt.f32 %v745_v40 }
 0x217   : > { %v714_v48 = vmul.f32 0.00390625, %v664_v30 }
 0x219   : > { %v746_v4 = vadd.f32 1e-05, %v714_v48  ;;  %v667_v20 = vpop.xlane.xlu1 %666 }
 0x21a   : > { %v715_v14 = vmul.f32 0.00390625, %v667_v20 }
 0x21b   : > { %2502 = vrsqrt.f32 %v746_v4 }
 0x21c   : > { %v747_v61 = vadd.f32 1e-05, %v715_v14 }
 0x21e   : > { %v670_v11 = vpop.xlane.xlu0 %669  ;;  %2504 = vrsqrt.f32 %v747_v61 }
 0x21f   : > { %v716_v8 = vmul.f32 0.00390625, %v670_v11 }
 0x220   : > { %v2499_v19 = vpop.eup %2498 }
 0x221   : > { %v748_v26 = vadd.f32 1e-05, %v716_v8  ;;  %v673_v24 = vpop.xlane.xlu1 %672  ;;  %v829_v9 = vmul.f32 %v2499_v19, %v3442_v41  ;;  %v828_v1 = vmul.f32 %v2499_v19, %v3439_v54 }
 0x222   : > { %v717_v34 = vmul.f32 0.00390625, %v673_v24 }
 0x223   : > { %v2501_v18 = vpop.eup %2500  ;;  %2506 = vrsqrt.f32 %v748_v26 }
 0x224   : > { %v749_v32 = vadd.f32 1e-05, %v717_v34  ;;  %v831_v33 = vmul.f32 %v2501_v18, %v3452_v0  ;;  %v830_v39 = vmul.f32 %v2501_v18, %v3449_v43  ;;  %v918_v18 = vlaneseq }
 0x226   : > { %v676_v46 = vpop.xlane.xlu0 %675  ;;  %2508 = vrsqrt.f32 %v749_v32  ;;  %v873_v44 = vpack.c.bf16 %v831_v33, %v829_v9  ;;  %v872_v17 = vpack.c.bf16 %v830_v39, %v828_v1  ;;  %v3618_v1 = vshrl.u32 %v918_v18, 7 }
 0x227   : > { %v718_v52 = vmul.f32 0.00390625, %v676_v46 }
 0x228   : > { %v2503_v16 = vpop.eup %2502  ;;  %1220 = vmatprep.mubr.bf16.mxu0 %v873_v44  ;;  %v920_v46 = vsub.s32 0, %v3618_v1  ;;  %v924_v44 = vsub.s32 1, %v3618_v1 }
 0x229   : > { %v750_v37 = vadd.f32 1e-05, %v718_v52  ;;  %v679_v63 = vpop.xlane.xlu1 %678  ;;  %1221 = vmatmul.mubr.bf16.gmra.mxu0 %v872_v17  ;;  %v833_v41 = vmul.f32 %v2503_v16, %v3462_v45  ;;  %v832_v43 = vmul.f32 %v2503_v16, %v3459_v42 }
 0x22a   : > { %v719_v27 = vmul.f32 0.00390625, %v679_v63 }
 0x22b   : > { %v2505_v15 = vpop.eup %2504  ;;  %2510 = vrsqrt.f32 %v750_v37 }
 0x22c   : > { %v751_v0 = vadd.f32 1e-05, %v719_v27  ;;  %v835_v54 = vmul.f32 %v2505_v15, %v3472_v10  ;;  %v834_v21 = vmul.f32 %v2505_v15, %v3469_v7 }
 0x22e   : > { %v682_v51 = vpop.xlane.xlu0 %681  ;;  %2512 = vrsqrt.f32 %v751_v0  ;;  %v875_v50 = vpack.c.bf16 %v835_v54, %v833_v41  ;;  %v874_v23 = vpack.c.bf16 %v834_v21, %v832_v43 }
 0x22f   : > { %v720_v58 = vmul.f32 0.00390625, %v682_v51 }
 0x230   : > { %v2507_v22 = vpop.eup %2506  ;;  %1230 = vmatprep.mubr.bf16.mxu0 %v875_v50 }
 0x231   : > { %v752_v6 = vadd.f32 1e-05, %v720_v58  ;;  %v685_v13 = vpop.xlane.xlu1 %684  ;;  %1231 = vmatmul.mubr.bf16.gmra.mxu0 %v874_v23  ;;  %v837_v45 = vmul.f32 %v2507_v22, %v3483_v49  ;;  %v836_v10 = vmul.f32 %v2507_v22, %v3480_v36 }
 0x232   : > { %v721_v3 = vmul.f32 0.00390625, %v685_v13 }
 0x233   : > { %v2509_v12 = vpop.eup %2508  ;;  %2514 = vrsqrt.f32 %v752_v6 }
 0x234   : > { %v753_v42 = vadd.f32 1e-05, %v721_v3  ;;  %v839_v7 = vmul.f32 %v2509_v12, %v3496_v59  ;;  %v838_v55 = vmul.f32 %v2509_v12, %v3493_v29 }
 0x236   : > { %v688_v38 = vpop.xlane.xlu0 %687  ;;  %2516 = vrsqrt.f32 %v753_v42  ;;  %v877_v30 = vpack.c.bf16 %v839_v7, %v837_v45  ;;  %v876_v48 = vpack.c.bf16 %v838_v55, %v836_v10 }
 0x237   : > { %v722_v40 = vmul.f32 0.00390625, %v688_v38 }
 0x238   : > { %v2511_v4 = vpop.eup %2510  ;;  %1240 = vmatprep.mubr.bf16.mxu0 %v877_v30 }
 0x239   : > { %v754_v20 = vadd.f32 1e-05, %v722_v40  ;;  %v691_v14 = vpop.xlane.xlu1 %690  ;;  %1241 = vmatmul.mubr.bf16.gmra.mxu0 %v876_v48  ;;  %v841_v36 = vmul.f32 %v2511_v4, %v3507_v53  ;;  %v840_v11 = vmul.f32 %v2511_v4, %v3504_v35 }
 0x23a   : > { %v723_v61 = vmul.f32 0.00390625, %v691_v14 }
 0x23b   : > { %v2513_v49 = vpop.eup %2512  ;;  %2518 = vrsqrt.f32 %v754_v20 }
 0x23c   : > { %v755_v59 = vadd.f32 1e-05, %v723_v61  ;;  %v843_v29 = vmul.f32 %v2513_v49, %v3520_v62  ;;  %v842_v8 = vmul.f32 %v2513_v49, %v3517_v5 }
 0x23e   : > { %2520 = vrsqrt.f32 %v755_v59  ;;  %v879_v19 = vpack.c.bf16 %v843_v29, %v841_v36  ;;  %v878_v26 = vpack.c.bf16 %v842_v8, %v840_v11 }
 0x240   : > { %1250 = vmatprep.mubr.bf16.mxu0 %v879_v19  ;;  %v2515_v24 = vpop.eup %2514 }
 0x241   : > { %1251 = vmatmul.mubr.bf16.gmra.mxu0 %v878_v26  ;;  %v845_v9 = vmul.f32 %v2515_v24, %v3531_v56  ;;  %v844_v35 = vmul.f32 %v2515_v24, %v3528_v28 }
 0x243   : > { %v2517_v34 = vpop.eup %2516 }
 0x244   : > { %v847_v53 = vmul.f32 %v2517_v34, %v3544_v2  ;;  %v846_v32 = vmul.f32 %v2517_v34, %v3541_v25  ;;  %v916_v25 = vld [vmem:[%s4083_s2] sm:$0x3] }
 0x245   : > { %v3631_v37 = vrot.slane %v916_v25, %v920_v46 }
 0x246   : > { %v881_v33 = vpack.c.bf16 %v847_v53, %v845_v9  ;;  %v880_v62 = vpack.c.bf16 %v846_v32, %v844_v35 }
 0x248   : > { %1260 = vmatprep.mubr.bf16.mxu0 %v881_v33  ;;  %v2519_v5 = vpop.eup %2518 }
 0x249   : > { %1261 = vmatmul.mubr.bf16.gmra.mxu0 %v880_v62  ;;  %v849_v52 = vmul.f32 %v2519_v5, %v3555_v60  ;;  %v848_v2 = vmul.f32 %v2519_v5, %v3552_v57  ;;  %v3635_v60 = vrot.slane %v916_v25, %v924_v44 }
 0x24b   : > { %v2521_v39 = vpop.eup %2520 }
 0x24c   : > { %v851_v56 = vmul.f32 %v2521_v39, %v3568_v47  ;;  %v850_v28 = vmul.f32 %v2521_v39, %v3565_v31 }
 0x24e   : > { %v883_v17 = vpack.c.bf16 %v851_v56, %v849_v52  ;;  %v882_v16 = vpack.c.bf16 %v850_v28, %v848_v2 }
 0x250   : > { %1270 = vmatprep.mubr.bf16.mxu0 %v883_v17 }
 0x251   : > { %1271 = vmatmul.mubr.bf16.gmra.mxu0 %v882_v16 }
 0x253   : > { %v1122_v57 = vpop.f32.mrf.mxu0 }
 0x254   : > { %v1123_v31 = vadd.f32 %v1122_v57, %v3631_v37 }
 0x255   : > { %v1124_v47 = vpop.f32.mrf.mxu0 }
 0x256   : > { %v1345_v63 = vmul.f32 0.70710677, %v1123_v31  ;;  %v1125_v27 = vadd.f32 %v1124_v47, %v3635_v60  ;;  %v1281_v5 = vmul.f32 0.5, %v1123_v31 }
 0x257   : > { %v1126_v15 = vpop.f32.mrf.mxu0 }
 0x258   : > { %v1346_v41 = vmul.f32 0.70710677, %v1125_v27  ;;  %v1127_v0 = vadd.f32 %v1126_v15, %v3631_v37  ;;  %2522 = verf.f32 %v1345_v63  ;;  %v1282_v53 = vmul.f32 0.5, %v1125_v27 }
 0x259   : > { %v1128_v54 = vpop.f32.mrf.mxu0 }
 0x25a   : > { %v1347_v43 = vmul.f32 0.70710677, %v1127_v0  ;;  %v1129_v21 = vadd.f32 %v1128_v54, %v3635_v60  ;;  %2524 = verf.f32 %v1346_v41  ;;  %v1283_v18 = vmul.f32 0.5, %v1127_v0 }
 0x25b   : > { %v1132_v51 = vpop.f32.mrf.mxu0 }
 0x25c   : > { %2526 = verf.f32 %v1347_v43  ;;  %v1348_v58 = vmul.f32 0.70710677, %v1129_v21  ;;  %v3642_v50 = vadd.f32 %v1132_v51, %v3631_v37  ;;  %v1284_v35 = vmul.f32 0.5, %v1129_v21 }
 0x25d   : > { %v1134_v23 = vpop.f32.mrf.mxu0 }
 0x25e   : > { %2528 = verf.f32 %v1348_v58  ;;  %v1349_v22 = vmul.f32 0.70710677, %v3642_v50  ;;  %v3646_v6 = vadd.f32 %v1134_v23, %v3635_v60 }
 0x25f   : > { %v1136_v13 = vpop.f32.mrf.mxu0 }
 0x260   : > { %v1350_v3 = vmul.f32 0.70710677, %v3646_v6  ;;  %v1137_v12 = vadd.f32 %v1136_v13, %v3631_v37  ;;  %2530 = verf.f32 %v1349_v22 }
 0x261   : > { %v1138_v45 = vpop.f32.mrf.mxu0 }
 0x262   : > { %v1351_v10 = vmul.f32 0.70710677, %v1137_v12  ;;  %v1139_v42 = vadd.f32 %v1138_v45, %v3635_v60  ;;  %2532 = verf.f32 %v1350_v3  ;;  %v1287_v51 = vmul.f32 0.5, %v1137_v12 }
 0x263   : > { %v1142_v7 = vpop.f32.mrf.mxu0 }
 0x264   : > { %2534 = verf.f32 %v1351_v10  ;;  %v1352_v55 = vmul.f32 0.70710677, %v1139_v42  ;;  %v3652_v38 = vadd.f32 %v1142_v7, %v3631_v37  ;;  %v1288_v58 = vmul.f32 0.5, %v1139_v42 }
 0x265   : > { %v1144_v40 = vpop.f32.mrf.mxu0  ;;  %v2523_v48 = vpop.eup %2522  ;;  %v1285_v10 = vmul.f32 0.5, %v3642_v50  ;;  %v1286_v7 = vmul.f32 0.5, %v3646_v6 }
 0x266   : > { %2536 = verf.f32 %v1352_v55  ;;  %v1353_v30 = vmul.f32 0.70710677, %v3652_v38  ;;  %v3656_v4 = vadd.f32 %v1144_v40, %v3635_v60  ;;  %v1473_v34 = vadd.f32 1.0, %v2523_v48 }
 0x267   : > { %v1146_v20 = vpop.f32.mrf.mxu0  ;;  %v2525_v14 = vpop.eup %2524 }
 0x268   : > { %v3659_v61 = vadd.f32 %v1146_v20, %v3631_v37  ;;  %v1354_v36 = vmul.f32 0.70710677, %v3656_v4  ;;  %2538 = verf.f32 %v1353_v30  ;;  %v1474_v24 = vadd.f32 1.0, %v2525_v14 }
 0x269   : > { %v2527_v49 = vpop.eup %2526  ;;  %v1148_v11 = vpop.f32.mrf.mxu0  ;;  %v1537_v16 = vmul.f32 %v1473_v34, %v1281_v5 }
 0x26a   : > { %v1475_v59 = vadd.f32 1.0, %v2527_v49  ;;  %v1355_v29 = vmul.f32 0.70710677, %v3659_v61  ;;  %v3664_v8 = vadd.f32 %v1148_v11, %v3635_v60  ;;  %2540 = verf.f32 %v1354_v36 }
 0x26b   : > { %v2529_v19 = vpop.eup %2528  ;;  %v1152_v26 = vpop.f32.mrf.mxu0  ;;  %v1538_v28 = vmul.f32 %v1474_v24, %v1282_v53 }
 0x26c   : > { %2542 = verf.f32 %v1355_v29  ;;  %v1356_v9 = vmul.f32 0.70710677, %v3664_v8  ;;  %v3668_v32 = vadd.f32 %v1152_v26, %v3631_v37  ;;  %v1476_v62 = vadd.f32 1.0, %v2529_v19 }
 0x26d   : > { %v1154_v33 = vpop.f32.mrf.mxu0  ;;  %v1539_v39 = vmul.f32 %v1475_v59, %v1283_v18  ;;  %v2531_v56 = vpop.eup %2530  ;;  %v1291_v29 = vmul.f32 0.5, %v3659_v61 }
 0x26e   : > { %2544 = verf.f32 %v1356_v9  ;;  %v3671_v52 = vadd.f32 %v1154_v33, %v3635_v60  ;;  %v1540_v25 = vmul.f32 %v1476_v62, %v1284_v35  ;;  %v1357_v57 = vmul.f32 0.70710677, %v3668_v32 }
 0x26f   : > { %v1156_v2 = vpop.f32.mrf.mxu0  ;;  %v2533_v17 = vpop.eup %2532  ;;  %v1601_v54 = vpack.c.bf16 %v1539_v39, %v1537_v16  ;;  %v1477_v13 = vadd.f32 1.0, %v2531_v56  ;;  %v1292_v35 = vmul.f32 0.5, %v3664_v8  ;;  %v1290_v56 = vmul.f32 0.5, %v3656_v4 }
 0x270   : > { %v1358_v47 = vmul.f32 0.70710677, %v3671_v52  ;;  %v3676_v27 = vadd.f32 %v1156_v2, %v3631_v37  ;;  %v1602_v15 = vpack.c.bf16 %v1540_v25, %v1538_v28  ;;  %v1478_v21 = vadd.f32 1.0, %v2533_v17 }
 0x271   : > { %v2535_v63 = vpop.eup %2534  ;;  %v1158_v31 = vpop.f32.mrf.mxu0  ;;  %v1541_v50 = vmul.f32 %v1477_v13, %v1285_v10  ;;  %v1289_v8 = vmul.f32 0.5, %v3652_v38 }
 0x272   : > { %v1479_v41 = vadd.f32 1.0, %v2535_v63  ;;  %2546 = verf.f32 %v1358_v47  ;;  %v3679_v0 = vadd.f32 %v1158_v31, %v3635_v60  ;;  %v1359_v23 = vmul.f32 0.70710677, %v3676_v27  ;;  %1869 = vmatprep.mubr.bf16.mxu1 %v1602_v15 }
 0x273   : > { %v2537_v43 = vpop.eup %2536  ;;  %v1162_v22 = vpop.f32.mrf.mxu0  ;;  %2548 = verf.f32 %v1357_v57  ;;  %1870 = vmatmul.mubr.bf16.vlgmr.msra.gmra.mxu1 %v1601_v54  ;;  %v1542_v20 = vmul.f32 %v1478_v21, %v1286_v7  ;;  %v1294_v54 = vmul.f32 0.5, %v3671_v52 }
 0x274   : > { %v1480_v3 = vadd.f32 1.0, %v2537_v43  ;;  %v1360_v45 = vmul.f32 0.70710677, %v3679_v0  ;;  %2550 = verf.f32 %v1359_v23  ;;  %v3686_v55 = vadd.f32 %v1162_v22, %v3631_v37 }
 0x275   : > { %v1164_v12 = vpop.f32.mrf.mxu0  ;;  %v1543_v42 = vmul.f32 %v1479_v41, %v1287_v51  ;;  %v2539_v48 = vpop.eup %2538  ;;  %v1295_v23 = vmul.f32 0.5, %v3676_v27  ;;  %v1296_v10 = vmul.f32 0.5, %v3679_v0 }
 0x276   : > { %v1544_v40 = vmul.f32 %v1480_v3, %v1288_v58  ;;  %2552 = verf.f32 %v1360_v45  ;;  %v3689_v30 = vadd.f32 %v1164_v12, %v3635_v60  ;;  %v1361_v14 = vmul.f32 0.70710677, %v3686_v55 }
 0x277   : > { %v1166_v49 = vpop.f32.mrf.mxu0  ;;  %v2541_v36 = vpop.eup %2540  ;;  %v1603_v18 = vpack.c.bf16 %v1543_v42, %v1541_v50  ;;  %v1481_v5 = vadd.f32 1.0, %v2539_v48  ;;  %v1293_v48 = vmul.f32 0.5, %v3668_v32 }
 0x278   : > { %v1362_v6 = vmul.f32 0.70710677, %v3689_v30  ;;  %v3694_v11 = vadd.f32 %v1166_v49, %v3631_v37  ;;  %v1604_v26 = vpack.c.bf16 %v1544_v40, %v1542_v20  ;;  %2554 = verf.f32 %v1361_v14 }
 0x279   : > { %v2543_v59 = vpop.eup %2542  ;;  %v1168_v19 = vpop.f32.mrf.mxu0  ;;  %v1482_v53 = vadd.f32 1.0, %v2541_v36  ;;  %v1545_v15 = vmul.f32 %v1481_v5, %v1289_v8 }
 0x27a   : > { %v1483_v24 = vadd.f32 1.0, %v2543_v59  ;;  %v1363_v34 = vmul.f32 0.70710677, %v3694_v11  ;;  %2556 = verf.f32 %v1362_v6  ;;  %v3700_v33 = vadd.f32 %v1168_v19, %v3635_v60  ;;  %1879 = vmatprep.mubr.bf16.mxu1 %v1604_v26 }
 0x27b   : > { %v2545_v9 = vpop.eup %2544  ;;  %v1172_v62 = vpop.f32.mrf.mxu0  ;;  %1880 = vmatmul.mubr.bf16.gmra.mxu1 %v1603_v18  ;;  %v1546_v47 = vmul.f32 %v1482_v53, %v1290_v56 }
 0x27c   : > { %v1484_v39 = vadd.f32 1.0, %v2545_v9  ;;  %2558 = verf.f32 %v1363_v34  ;;  %v3703_v61 = vadd.f32 %v1172_v62, %v3631_v37  ;;  %v1364_v2 = vmul.f32 0.70710677, %v3700_v33 }
 0x27d   : > { %v1174_v28 = vpop.f32.mrf.mxu0  ;;  %v1547_v25 = vmul.f32 %v1483_v24, %v1291_v29 }
 0x27e   : > { %v1548_v17 = vmul.f32 %v1484_v39, %v1292_v35  ;;  %v3709_v16 = vadd.f32 %v1174_v28, %v3635_v60  ;;  %2560 = verf.f32 %v1364_v2  ;;  %v1365_v63 = vmul.f32 0.70710677, %v3703_v61 }
 0x27f   : > { %v2547_v57 = vpop.eup %2546  ;;  %v1176_v31 = vpop.f32.mrf.mxu0  ;;  %v1605_v13 = vpack.c.bf16 %v1547_v25, %v1545_v15  ;;  %v1299_v28 = vmul.f32 0.5, %v3694_v11  ;;  %v1298_v25 = vmul.f32 0.5, %v3689_v30 }
 0x280   : > { %v1366_v41 = vmul.f32 0.70710677, %v3709_v16  ;;  %v2549_v4 = vpop.eup %2548  ;;  %v1486_v43 = vadd.f32 1.0, %v2547_v57  ;;  %v3715_v38 = vadd.f32 %v1176_v31, %v3631_v37  ;;  %v1606_v51 = vpack.c.bf16 %v1548_v17, %v1546_v47 }
 0x281   : > { %v1178_v21 = vpop.f32.mrf.mxu0  ;;  %v2551_v58 = vpop.eup %2550  ;;  %v1485_v12 = vadd.f32 1.0, %v2549_v4  ;;  %v1300_v17 = vmul.f32 0.5, %v3700_v33  ;;  %v1297_v31 = vmul.f32 0.5, %v3686_v55  ;;  %v1302_v30 = vmul.f32 0.5, %v3709_v16 }
 0x282   : > { %2562 = verf.f32 %v1366_v41  ;;  %v3719_v22 = vadd.f32 %v1178_v21, %v3635_v60  ;;  %v1487_v45 = vadd.f32 1.0, %v2551_v58  ;;  %v1367_v52 = vmul.f32 0.70710677, %v3715_v38  ;;  %1889 = vmatprep.mubr.bf16.mxu1 %v1606_v51 }
 0x283   : > { %v2553_v3 = vpop.eup %2552  ;;  %2564 = verf.f32 %v1365_v63  ;;  %v1182_v7 = vpop.f32.mrf.mxu0  ;;  %1890 = vmatmul.mubr.bf16.gmra.mxu1 %v1605_v13  ;;  %v1550_v20 = vmul.f32 %v1486_v43, %v1294_v54  ;;  %v1549_v19 = vmul.f32 %v1485_v12, %v1293_v48  ;;  %v1303_v58 = vmul.f32 0.5, %v3715_v38 }
 0x284   : > { %v1488_v42 = vadd.f32 1.0, %v2553_v3  ;;  %v1368_v40 = vmul.f32 0.70710677, %v3719_v22  ;;  %v3725_v27 = vadd.f32 %v1182_v7, %v3631_v37  ;;  %2566 = verf.f32 %v1367_v52 }
 0x285   : > { %v1184_v14 = vpop.f32.mrf.mxu0  ;;  %v1551_v49 = vmul.f32 %v1487_v45, %v1295_v23  ;;  %v2555_v50 = vpop.eup %2554  ;;  %v1304_v52 = vmul.f32 0.5, %v3719_v22  ;;  %v1301_v22 = vmul.f32 0.5, %v3703_v61 }
 0x286   : > { %v1552_v0 = vmul.f32 %v1488_v42, %v1296_v10  ;;  %2568 = verf.f32 %v1368_v40  ;;  %v1369_v36 = vmul.f32 0.70710677, %v3725_v27  ;;  %v3730_v6 = vadd.f32 %v1184_v14, %v3635_v60 }
 0x287   : > { %v1186_v59 = vpop.f32.mrf.mxu0  ;;  %v2557_v29 = vpop.eup %2556  ;;  %v1607_v35 = vpack.c.bf16 %v1551_v49, %v1549_v19  ;;  %v1489_v2 = vadd.f32 1.0, %v2555_v50 }
 0x288   : > { %v3733_v26 = vadd.f32 %v1186_v59, %v3631_v37  ;;  %v1608_v24 = vpack.c.bf16 %v1552_v0, %v1550_v20  ;;  %v1370_v34 = vmul.f32 0.70710677, %v3730_v6  ;;  %2570 = verf.f32 %v1369_v36 }
 0x289   : > { %v2559_v32 = vpop.eup %2558  ;;  %v1188_v18 = vpop.f32.mrf.mxu0  ;;  %v1490_v62 = vadd.f32 1.0, %v2557_v29  ;;  %v1553_v51 = vmul.f32 %v1489_v2, %v1297_v31  ;;  %v1305_v31 = vmul.f32 0.5, %v3725_v27 }
 0x28a   : > { %v1491_v9 = vadd.f32 1.0, %v2559_v32  ;;  %v1371_v53 = vmul.f32 0.70710677, %v3733_v26  ;;  %1899 = vmatprep.mubr.bf16.mxu1 %v1608_v24  ;;  %2572 = verf.f32 %v1370_v34  ;;  %v3738_v5 = vadd.f32 %v1188_v18, %v3635_v60 }
 0x28b   : > { %v1192_v39 = vpop.f32.mrf.mxu0  ;;  %v2561_v56 = vpop.eup %2560  ;;  %1900 = vmatmul.mubr.bf16.gmra.mxu1 %v1607_v35  ;;  %v1554_v4 = vmul.f32 %v1490_v62, %v1298_v25 }
 0x28c   : > { %2574 = verf.f32 %v1371_v53  ;;  %v3742_v8 = vadd.f32 %v1192_v39, %v3631_v37  ;;  %v1492_v57 = vadd.f32 1.0, %v2561_v56  ;;  %v1372_v47 = vmul.f32 0.70710677, %v3738_v5 }
 0x28d   : > { %v1194_v63 = vpop.f32.mrf.mxu0  ;;  %v1555_v15 = vmul.f32 %v1491_v9, %v1299_v28 }
 0x28e   : > { %v3749_v41 = vadd.f32 %v1194_v63, %v3635_v60  ;;  %v1556_v54 = vmul.f32 %v1492_v57, %v1300_v17  ;;  %2576 = verf.f32 %v1372_v47  ;;  %v1373_v33 = vmul.f32 0.70710677, %v3742_v8 }
 0x28f   : > { %v2563_v11 = vpop.eup %2562  ;;  %v1196_v43 = vpop.f32.mrf.mxu0  ;;  %v1609_v12 = vpack.c.bf16 %v1555_v15, %v1553_v51  ;;  %v1307_v57 = vmul.f32 0.5, %v3733_v26  ;;  %v1306_v15 = vmul.f32 0.5, %v3730_v6 }
 0x290   : > { %v2565_v21 = vpop.eup %2564  ;;  %v1374_v23 = vmul.f32 0.70710677, %v3749_v41  ;;  %v3756_v55 = vadd.f32 %v1196_v43, %v3631_v37  ;;  %v1610_v3 = vpack.c.bf16 %v1556_v54, %v1554_v4  ;;  %v1494_v10 = vadd.f32 1.0, %v2563_v11 }
 0x291   : > { %v1198_v13 = vpop.f32.mrf.mxu0  ;;  %v2567_v45 = vpop.eup %2566  ;;  %v1493_v42 = vadd.f32 1.0, %v2565_v21  ;;  %v1308_v54 = vmul.f32 0.5, %v3738_v5 }
 0x292   : > { %v3760_v7 = vadd.f32 %v1198_v13, %v3635_v60  ;;  %v1495_v40 = vadd.f32 1.0, %v2567_v45  ;;  %2578 = verf.f32 %v1374_v23  ;;  %v1375_v38 = vmul.f32 0.70710677, %v3756_v55  ;;  %1909 = vmatprep.mubr.bf16.mxu1 %v1610_v3 }
 0x293   : > { %v2569_v16 = vpop.eup %2568  ;;  %v1202_v48 = vpop.f32.mrf.mxu0  ;;  %2580 = verf.f32 %v1373_v33  ;;  %1910 = vmatmul.mubr.bf16.gmra.mxu1 %v1609_v12  ;;  %v1558_v50 = vmul.f32 %v1494_v10, %v1302_v30  ;;  %v1557_v19 = vmul.f32 %v1493_v42, %v1301_v22  ;;  %v1310_v45 = vmul.f32 0.5, %v3749_v41 }
 0x294   : > { %v1496_v20 = vadd.f32 1.0, %v2569_v16  ;;  %v1376_v14 = vmul.f32 0.70710677, %v3760_v7  ;;  %v3765_v49 = vadd.f32 %v1202_v48, %v3631_v37  ;;  %v1559_v0 = vmul.f32 %v1495_v40, %v1303_v58 }
 0x295   : > { %2582 = verf.f32 %v1375_v38  ;;  %v1204_v36 = vpop.f32.mrf.mxu0  ;;  %v2571_v29 = vpop.eup %2570  ;;  %v1312_v22 = vmul.f32 0.5, %v3760_v7 }
 0x296   : > { %v1560_v59 = vmul.f32 %v1496_v20, %v1304_v52  ;;  %2584 = verf.f32 %v1376_v14  ;;  %v1377_v24 = vmul.f32 0.70710677, %v3765_v49  ;;  %v3770_v32 = vadd.f32 %v1204_v36, %v3635_v60 }
 0x297   : > { %v1206_v34 = vpop.f32.mrf.mxu0  ;;  %v2573_v18 = vpop.eup %2572  ;;  %v1611_v39 = vpack.c.bf16 %v1559_v0, %v1557_v19  ;;  %v1497_v25 = vadd.f32 1.0, %v2571_v29  ;;  %v1311_v20 = vmul.f32 0.5, %v3756_v55 }
 0x298   : > { %v3773_v9 = vadd.f32 %v1206_v34, %v3631_v37  ;;  %v1612_v53 = vpack.c.bf16 %v1560_v59, %v1558_v50  ;;  %v1378_v35 = vmul.f32 0.70710677, %v3770_v32  ;;  %2586 = verf.f32 %v1377_v24 }
 0x299   : > { %v2575_v61 = vpop.eup %2574  ;;  %v1208_v62 = vpop.f32.mrf.mxu0  ;;  %v1498_v17 = vadd.f32 1.0, %v2573_v18  ;;  %v1561_v30 = vmul.f32 %v1497_v25, %v1305_v31  ;;  %v1309_v50 = vmul.f32 0.5, %v3742_v8 }
 0x29a   : > { %v1499_v56 = vadd.f32 1.0, %v2575_v61  ;;  %v1379_v2 = vmul.f32 0.70710677, %v3773_v9  ;;  %v3778_v28 = vadd.f32 %v1208_v62, %v3635_v60  ;;  %1919 = vmatprep.mubr.bf16.mxu1 %v1612_v53  ;;  %2588 = verf.f32 %v1378_v35 }
 0x29b   : > { %v1212_v47 = vpop.f32.mrf.mxu0  ;;  %v2577_v63 = vpop.eup %2576  ;;  %1920 = vmatmul.mubr.bf16.gmra.mxu1 %v1611_v39  ;;  %v1562_v27 = vmul.f32 %v1498_v17, %v1306_v15  ;;  %v1314_v39 = vmul.f32 0.5, %v3770_v32  ;;  %v1313_v17 = vmul.f32 0.5, %v3765_v49 }
 0x29c   : > { %2590 = verf.f32 %v1379_v2  ;;  %v1380_v11 = vmul.f32 0.70710677, %v3778_v28  ;;  %v1563_v4 = vmul.f32 %v1499_v56, %v1307_v57  ;;  %v1500_v43 = vadd.f32 1.0, %v2577_v63 }
 0x29d   : > { %v3786_v21 = vadd.f32 %v1212_v47, %v3631_v37  ;;  %v1214_v51 = vpop.f32.mrf.mxu0  ;;  %v1315_v2 = vmul.f32 0.5, %v3773_v9  ;;  %v1316_v8 = vmul.f32 0.5, %v3778_v28 }
 0x29e   : > { %2592 = verf.f32 %v1380_v11  ;;  %v3789_v26 = vadd.f32 %v1214_v51, %v3635_v60  ;;  %v1564_v33 = vmul.f32 %v1500_v43, %v1308_v54  ;;  %v1613_v12 = vpack.c.bf16 %v1563_v4, %v1561_v30 }
 0x29f   : > { %v1381_v6 = vmul.f32 0.70710677, %v3786_v21  ;;  %v1216_v58 = vpop.f32.mrf.mxu0  ;;  %v2579_v23 = vpop.eup %2578  ;;  %v1317_v49 = vmul.f32 0.5, %v3786_v21 }
 0x2a0   : > { %v1382_v13 = vmul.f32 0.70710677, %v3789_v26  ;;  %v1217_v5 = vadd.f32 %v1216_v58, %v3631_v37  ;;  %v2581_v3 = vpop.eup %2580  ;;  %v1614_v52 = vpack.c.bf16 %v1564_v33, %v1562_v27  ;;  %v1502_v42 = vadd.f32 1.0, %v2579_v23 }
 0x2a1   : > { %v1218_v10 = vpop.f32.mrf.mxu0  ;;  %v1501_v0 = vadd.f32 1.0, %v2581_v3  ;;  %v1318_v9 = vmul.f32 0.5, %v3789_v26 }
 0x2a2   : > { %v2583_v16 = vpop.eup %2582  ;;  %2594 = verf.f32 %v1382_v13  ;;  %v1383_v40 = vmul.f32 0.70710677, %v1217_v5  ;;  %v1219_v38 = vadd.f32 %v1218_v10, %v3635_v60  ;;  %1929 = vmatprep.mubr.bf16.mxu1 %v1614_v52  ;;  %v1566_v59 = vmul.f32 %v1502_v42, %v1310_v45 }
 0x2a3   : > { %v2585_v48 = vpop.eup %2584  ;;  %v1503_v14 = vadd.f32 1.0, %v2583_v16  ;;  %2596 = verf.f32 %v1381_v6  ;;  %1930 = vmatmul.mubr.bf16.gmra.mxu1 %v1613_v12  ;;  %v1565_v18 = vmul.f32 %v1501_v0, %v1309_v50  ;;  %v1319_v27 = vmul.f32 0.5, %v1217_v5 }
 0x2a4   : > { %v1504_v36 = vadd.f32 1.0, %v2585_v48  ;;  %2598 = verf.f32 %v1383_v40  ;;  %v1384_v41 = vmul.f32 0.70710677, %v1219_v38  ;;  %v1320_v33 = vmul.f32 0.5, %v1219_v38 }
 0x2a5   : > { %v1567_v29 = vmul.f32 %v1503_v14, %v1311_v20  ;;  %v2587_v24 = vpop.eup %2586 }
 0x2a6   : > { %v1568_v19 = vmul.f32 %v1504_v36, %v1312_v22  ;;  %2600 = verf.f32 %v1384_v41  ;;  %v1505_v56 = vadd.f32 1.0, %v2587_v24 }
 0x2a7   : > { %v2589_v34 = vpop.eup %2588  ;;  %v1615_v35 = vpack.c.bf16 %v1567_v29, %v1565_v18 }
 0x2a8   : > { %v1616_v55 = vpack.c.bf16 %v1568_v19, %v1566_v59  ;;  %v1506_v61 = vadd.f32 1.0, %v2589_v34  ;;  %v1569_v11 = vmul.f32 %v1505_v56, %v1313_v17 }
 0x2a9   : > { %v2591_v53 = vpop.eup %2590 }
 0x2aa   : > { %v1507_v7 = vadd.f32 1.0, %v2591_v53  ;;  %1939 = vmatprep.mubr.bf16.mxu1 %v1616_v55  ;;  %v1570_v57 = vmul.f32 %v1506_v61, %v1314_v39 }
 0x2ab   : > { %v2593_v62 = vpop.eup %2592  ;;  %1940 = vmatmul.mubr.bf16.gmra.mxu1 %v1615_v35 }
 0x2ac   : > { %v1508_v25 = vadd.f32 1.0, %v2593_v62  ;;  %v1571_v47 = vmul.f32 %v1507_v7, %v1315_v2 }
 0x2ae   : > { %v1572_v63 = vmul.f32 %v1508_v25, %v1316_v8  ;;  %v1617_v32 = vpack.c.bf16 %v1571_v47, %v1569_v11 }
 0x2af   : > { %v2595_v31 = vpop.eup %2594 }
 0x2b0   : > { %v2597_v15 = vpop.eup %2596  ;;  %v1618_v4 = vpack.c.bf16 %v1572_v63, %v1570_v57  ;;  %v1510_v43 = vadd.f32 1.0, %v2595_v31 }
 0x2b1   : > { %v2599_v54 = vpop.eup %2598  ;;  %v1509_v28 = vadd.f32 1.0, %v2597_v15 }
 0x2b2   : > { %v1511_v51 = vadd.f32 1.0, %v2599_v54  ;;  %1949 = vmatprep.mubr.bf16.mxu1 %v1618_v4  ;;  %v1574_v58 = vmul.f32 %v1510_v43, %v1318_v9 }
 0x2b3   : > { %v2601_v30 = vpop.eup %2600  ;;  %1950 = vmatmul.mubr.bf16.gmra.mxu1 %v1617_v32  ;;  %v1573_v3 = vmul.f32 %v1509_v28, %v1317_v49 }
 0x2b4   : > { %v1512_v6 = vadd.f32 1.0, %v2601_v30  ;;  %v1575_v23 = vmul.f32 %v1511_v51, %v1319_v27 }
 0x2b6   : > { %v1576_v13 = vmul.f32 %v1512_v6, %v1320_v33  ;;  %v1619_v10 = vpack.c.bf16 %v1575_v23, %v1573_v3 }
 0x2b8   : > { %v1620_v45 = vpack.c.bf16 %v1576_v13, %v1574_v58 }
 0x2ba   : > { %1959 = vmatprep.mubr.bf16.mxu1 %v1620_v45 }
 0x2bb   : > { %1960 = vmatmul.mubr.bf16.gmra.mxu1 %v1619_v10 }
 0x2e9   : > { %v1222_v52 = vpop.f32.mrf.mxu0 }
 0x2ea   : > { %v1223_v12 = vadd.f32 %v1222_v52, %v3631_v37 }
 0x2eb   : > { %v1224_v16 = vpop.f32.mrf.mxu0 }
 0x2ec   : > { %v1385_v26 = vmul.f32 0.70710677, %v1223_v12  ;;  %v1225_v5 = vadd.f32 %v1224_v16, %v3635_v60  ;;  %v1321_v9 = vmul.f32 0.5, %v1223_v12 }
 0x2ed   : > { %v1226_v42 = vpop.f32.mrf.mxu0 }
 0x2ee   : > { %v1386_v40 = vmul.f32 0.70710677, %v1225_v5  ;;  %v1227_v38 = vadd.f32 %v1226_v42, %v3631_v37  ;;  %2602 = verf.f32 %v1385_v26  ;;  %v1322_v28 = vmul.f32 0.5, %v1225_v5 }
 0x2ef   : > { %v1228_v21 = vpop.f32.mrf.mxu0 }
 0x2f0   : > { %v1387_v48 = vmul.f32 0.70710677, %v1227_v38  ;;  %v1229_v20 = vadd.f32 %v1228_v21, %v3635_v60  ;;  %2604 = verf.f32 %v1386_v40  ;;  %v1323_v47 = vmul.f32 0.5, %v1227_v38 }
 0x2f1   : > { %v1232_v14 = vpop.f32.mrf.mxu0 }
 0x2f2   : > { %2606 = verf.f32 %v1387_v48  ;;  %v1388_v22 = vmul.f32 0.70710677, %v1229_v20  ;;  %v3810_v0 = vadd.f32 %v1232_v14, %v3631_v37  ;;  %v1324_v51 = vmul.f32 0.5, %v1229_v20 }
 0x2f3   : > { %v1234_v36 = vpop.f32.mrf.mxu0 }
 0x2f4   : > { %2608 = verf.f32 %v1388_v22  ;;  %v1235_v41 = vadd.f32 %v1234_v36, %v3635_v60  ;;  %v1389_v50 = vmul.f32 0.70710677, %v3810_v0 }
 0x2f5   : > { %v1236_v59 = vpop.f32.mrf.mxu0 }
 0x2f6   : > { %v1390_v29 = vmul.f32 0.70710677, %v1235_v41  ;;  %v1237_v19 = vadd.f32 %v1236_v59, %v3631_v37  ;;  %v1326_v26 = vmul.f32 0.5, %v1235_v41 }
 0x2f7   : > { %v1238_v24 = vpop.f32.mrf.mxu0 }
 0x2f8   : > { %2610 = verf.f32 %v1390_v29  ;;  %v1391_v34 = vmul.f32 0.70710677, %v1237_v19  ;;  %v1239_v18 = vadd.f32 %v1238_v24, %v3635_v60  ;;  %v1327_v36 = vmul.f32 0.5, %v1237_v19 }
 0x2f9   : > { %2612 = verf.f32 %v1389_v50  ;;  %v1242_v55 = vpop.f32.mrf.mxu0 }
 0x2fa   : > { %2614 = verf.f32 %v1391_v34  ;;  %v1392_v53 = vmul.f32 0.70710677, %v1239_v18  ;;  %v3817_v61 = vadd.f32 %v1242_v55, %v3631_v37  ;;  %v1328_v41 = vmul.f32 0.5, %v1239_v18 }
 0x2fb   : > { %v1244_v7 = vpop.f32.mrf.mxu0  ;;  %v2603_v62 = vpop.eup %2602  ;;  %v1325_v34 = vmul.f32 0.5, %v3810_v0 }
 0x2fc   : > { %2616 = verf.f32 %v1392_v53  ;;  %v1393_v35 = vmul.f32 0.70710677, %v3817_v61  ;;  %v3821_v39 = vadd.f32 %v1244_v7, %v3635_v60  ;;  %v1513_v11 = vadd.f32 1.0, %v2603_v62 }
 0x2fd   : > { %v1246_v56 = vpop.f32.mrf.mxu0  ;;  %v2605_v2 = vpop.eup %2604 }
 0x2fe   : > { %v3824_v8 = vadd.f32 %v1246_v56, %v3631_v37  ;;  %v1394_v17 = vmul.f32 0.70710677, %v3821_v39  ;;  %2618 = verf.f32 %v1393_v35  ;;  %v1514_v4 = vadd.f32 1.0, %v2605_v2 }
 0x2ff   : > { %v2607_v25 = vpop.eup %2606  ;;  %v1248_v57 = vpop.f32.mrf.mxu0  ;;  %v1577_v13 = vmul.f32 %v1513_v11, %v1321_v9 }
 0x300   : > { %v1515_v63 = vadd.f32 1.0, %v2607_v25  ;;  %v1395_v31 = vmul.f32 0.70710677, %v3824_v8  ;;  %2620 = verf.f32 %v1394_v17  ;;  %v3829_v54 = vadd.f32 %v1248_v57, %v3635_v60 }
 0x301   : > { %v2609_v15 = vpop.eup %2608  ;;  %v1252_v43 = vpop.f32.mrf.mxu0  ;;  %v1578_v3 = vmul.f32 %v1514_v4, %v1322_v28 }
 0x302   : > { %v1516_v32 = vadd.f32 1.0, %v2609_v15  ;;  %2622 = verf.f32 %v1395_v31  ;;  %v3832_v30 = vadd.f32 %v1252_v43, %v3631_v37  ;;  %v1579_v27 = vmul.f32 %v1515_v63, %v1323_v47 }
 0x303   : > { %v1396_v33 = vmul.f32 0.70710677, %v3829_v54  ;;  %v1254_v6 = vpop.f32.mrf.mxu0 }
 0x304   : > { %v1580_v49 = vmul.f32 %v1516_v32, %v1324_v51  ;;  %v1397_v58 = vmul.f32 0.70710677, %v3832_v30  ;;  %v3837_v45 = vadd.f32 %v1254_v6, %v3635_v60  ;;  %v1621_v38 = vpack.c.bf16 %v1579_v27, %v1577_v13 }
 0x305   : > { %v2611_v23 = vpop.eup %2610  ;;  %2624 = verf.f32 %v1396_v33  ;;  %v1256_v10 = vpop.f32.mrf.mxu0  ;;  %v1331_v27 = vmul.f32 0.5, %v3824_v8  ;;  %v1330_v6 = vmul.f32 0.5, %v3821_v39 }
 0x306   : > { %v2613_v52 = vpop.eup %2612  ;;  %v3840_v16 = vadd.f32 %v1256_v10, %v3631_v37  ;;  %v1398_v5 = vmul.f32 0.70710677, %v3837_v45  ;;  %v1622_v40 = vpack.c.bf16 %v1580_v49, %v1578_v3  ;;  %v1518_v21 = vadd.f32 1.0, %v2611_v23 }
 0x307   : > { %v2615_v12 = vpop.eup %2614  ;;  %v1258_v42 = vpop.f32.mrf.mxu0  ;;  %2626 = verf.f32 %v1397_v58  ;;  %v1517_v22 = vadd.f32 1.0, %v2613_v52  ;;  %v1332_v49 = vmul.f32 0.5, %v3829_v54  ;;  %v1329_v3 = vmul.f32 0.5, %v3817_v61 }
 0x308   : > { %v1519_v48 = vadd.f32 1.0, %v2615_v12  ;;  %v1399_v20 = vmul.f32 0.70710677, %v3840_v16  ;;  %2628 = verf.f32 %v1398_v5  ;;  %v3845_v50 = vadd.f32 %v1258_v42, %v3635_v60  ;;  %1969 = vmatprep.mubr.bf16.mxu1 %v1622_v40 }
 0x309   : > { %v2617_v14 = vpop.eup %2616  ;;  %v1262_v59 = vpop.f32.mrf.mxu0  ;;  %1970 = vmatmul.mubr.bf16.gmra.mxu1 %v1621_v38  ;;  %v1582_v19 = vmul.f32 %v1518_v21, %v1326_v26  ;;  %v1581_v2 = vmul.f32 %v1517_v22, %v1325_v34  ;;  %v1335_v34 = vmul.f32 0.5, %v3840_v16 }
 0x30a   : > { %v1520_v29 = vadd.f32 1.0, %v2617_v14  ;;  %2630 = verf.f32 %v1399_v20  ;;  %v3848_v24 = vadd.f32 %v1262_v59, %v3631_v37  ;;  %v1583_v55 = vmul.f32 %v1519_v48, %v1327_v36 }
 0x30b   : > { %v1400_v53 = vmul.f32 0.70710677, %v3845_v50  ;;  %v1264_v7 = vpop.f32.mrf.mxu0  ;;  %v2619_v56 = vpop.eup %2618 }
 0x30c   : > { %v1584_v35 = vmul.f32 %v1520_v29, %v1328_v41  ;;  %v1401_v62 = vmul.f32 0.70710677, %v3848_v24  ;;  %v3854_v18 = vadd.f32 %v1264_v7, %v3635_v60  ;;  %v1623_v15 = vpack.c.bf16 %v1583_v55, %v1581_v2 }
 0x30d   : > { %2632 = verf.f32 %v1400_v53  ;;  %v1266_v25 = vpop.f32.mrf.mxu0  ;;  %v2621_v17 = vpop.eup %2620  ;;  %v1521_v28 = vadd.f32 1.0, %v2619_v56  ;;  %v1336_v55 = vmul.f32 0.5, %v3845_v50 }
 0x30e   : > { %v3857_v57 = vadd.f32 %v1266_v25, %v3631_v37  ;;  %v1624_v0 = vpack.c.bf16 %v1584_v35, %v1582_v19  ;;  %v1402_v63 = vmul.f32 0.70710677, %v3854_v18  ;;  %2634 = verf.f32 %v1401_v62 }
 0x30f   : > { %v2623_v47 = vpop.eup %2622  ;;  %v1268_v31 = vpop.f32.mrf.mxu0  ;;  %v1522_v51 = vadd.f32 1.0, %v2621_v17  ;;  %v1585_v54 = vmul.f32 %v1521_v28, %v1329_v3  ;;  %v1333_v19 = vmul.f32 0.5, %v3832_v30 }
 0x310   : > { %v1523_v11 = vadd.f32 1.0, %v2623_v47  ;;  %v1403_v4 = vmul.f32 0.70710677, %v3857_v57  ;;  %v3862_v43 = vadd.f32 %v1268_v31, %v3635_v60  ;;  %1979 = vmatprep.mubr.bf16.mxu1 %v1624_v0  ;;  %2636 = verf.f32 %v1402_v63 }
 0x311   : > { %v1272_v32 = vpop.f32.mrf.mxu0  ;;  %1980 = vmatmul.mubr.bf16.gmra.mxu1 %v1623_v15  ;;  %v1586_v12 = vmul.f32 %v1522_v51, %v1330_v6  ;;  %v1339_v15 = vmul.f32 0.5, %v3857_v57 }
 0x312   : > { %v2625_v9 = vpop.eup %2624  ;;  %2638 = verf.f32 %v1403_v4  ;;  %v1404_v33 = vmul.f32 0.70710677, %v3862_v43  ;;  %v3869_v23 = vadd.f32 %v1272_v32, %v3631_v37  ;;  %v1587_v10 = vmul.f32 %v1523_v11, %v1331_v27 }
 0x313   : > { %v1524_v58 = vadd.f32 1.0, %v2625_v9  ;;  %v1274_v13 = vpop.f32.mrf.mxu0  ;;  %v1340_v30 = vmul.f32 0.5, %v3862_v43  ;;  %v1337_v4 = vmul.f32 0.5, %v3848_v24 }
 0x314   : > { %2640 = verf.f32 %v1404_v33  ;;  %v3873_v52 = vadd.f32 %v1274_v13, %v3635_v60  ;;  %v2627_v8 = vpop.eup %2626  ;;  %v1405_v5 = vmul.f32 0.70710677, %v3869_v23  ;;  %v1625_v22 = vpack.c.bf16 %v1587_v10, %v1585_v54 }
 0x315   : > { %v1588_v26 = vmul.f32 %v1524_v58, %v1332_v49  ;;  %v1276_v39 = vpop.f32.mrf.mxu0  ;;  %v2629_v42 = vpop.eup %2628  ;;  %v1525_v29 = vadd.f32 1.0, %v2627_v8 }
 0x316   : > { %v1406_v40 = vmul.f32 0.70710677, %v3873_v52  ;;  %v1277_v38 = vadd.f32 %v1276_v39, %v3631_v37  ;;  %2642 = verf.f32 %v1405_v5  ;;  %v1526_v36 = vadd.f32 1.0, %v2629_v42  ;;  %v1665_v42 = vld [vmem:[%s4085_s4] sm:$0x3] }
 0x317   : > { %v2631_v21 = vpop.eup %2630  ;;  %v1278_v48 = vpop.f32.mrf.mxu0  ;;  %v1626_v61 = vpack.c.bf16 %v1588_v26, %v1586_v12  ;;  %v1334_v37 = vmul.f32 0.5, %v3837_v45  ;;  %v1589_v25 = vmul.f32 %v1525_v29, %v1333_v19  ;;  %v1338_v45 = vmul.f32 0.5, %v3854_v18 }
 0x318   : > { %v1527_v20 = vadd.f32 1.0, %v2631_v21  ;;  %v1407_v14 = vmul.f32 0.70710677, %v1277_v38  ;;  %2644 = verf.f32 %v1406_v40  ;;  %v1279_v59 = vadd.f32 %v1278_v48, %v3635_v60 }
 0x319   : > { %1989 = vmatprep.mubr.bf16.mxu1 %v1626_v61  ;;  %v1590_v56 = vmul.f32 %v1526_v36, %v1334_v37  ;;  %v1343_v10 = vmul.f32 0.5, %v1277_v38  ;;  %v1342_v43 = vmul.f32 0.5, %v3873_v52  ;;  %v1341_v12 = vmul.f32 0.5, %v3869_v23 }
 0x31a   : > { %v2633_v41 = vpop.eup %2632  ;;  %2646 = verf.f32 %v1407_v14  ;;  %1990 = vmatmul.mubr.bf16.gmra.mxu1 %v1625_v22  ;;  %v1408_v7 = vmul.f32 0.70710677, %v1279_v59  ;;  %v1591_v35 = vmul.f32 %v1527_v20, %v1335_v34  ;;  %v1344_v8 = vmul.f32 0.5, %v1279_v59 }
 0x31b   : > { %v1528_v53 = vadd.f32 1.0, %v2633_v41  ;;  %v2635_v62 = vpop.eup %2634  ;;  %v3894_v38 = vrot.slane %v1665_v42, %v920_v46  ;;  %v3898_v52 = vrot.slane %v1665_v42, %v924_v44 }
 0x31c   : > { %2648 = verf.f32 %v1408_v7  ;;  %v1627_v63 = vpack.c.bf16 %v1591_v35, %v1589_v25  ;;  %v1529_v50 = vadd.f32 1.0, %v2635_v62 }
 0x31d   : > { %v1592_v2 = vmul.f32 %v1528_v53, %v1336_v55  ;;  %v2637_v60 = vpop.eup %2636 }
 0x31e   : > { %v1530_v16 = vadd.f32 1.0, %v2637_v60  ;;  %v1593_v33 = vmul.f32 %v1529_v50, %v1337_v4 }
 0x31f   : > { %v2639_v17 = vpop.eup %2638  ;;  %v1628_v0 = vpack.c.bf16 %v1592_v2, %v1590_v56 }
 0x320   : > { %v1531_v47 = vadd.f32 1.0, %v2639_v17  ;;  %v1594_v51 = vmul.f32 %v1530_v16, %v1338_v45 }
 0x321   : > { %v2641_v31 = vpop.eup %2640  ;;  %1999 = vmatprep.mubr.bf16.mxu1 %v1628_v0 }
 0x322   : > { %v1532_v11 = vadd.f32 1.0, %v2641_v31  ;;  %2000 = vmatmul.mubr.bf16.gmra.mxu1 %v1627_v63  ;;  %v1595_v32 = vmul.f32 %v1531_v47, %v1339_v15 }
 0x323   : > { %v2643_v28 = vpop.eup %2642 }
 0x324   : > { %v1596_v9 = vmul.f32 %v1532_v11, %v1340_v30  ;;  %v1629_v18 = vpack.c.bf16 %v1595_v32, %v1593_v33  ;;  %v1533_v57 = vadd.f32 1.0, %v2643_v28 }
 0x325   : > { %v2645_v27 = vpop.eup %2644 }
 0x326   : > { %v1630_v6 = vpack.c.bf16 %v1596_v9, %v1594_v51  ;;  %v1534_v13 = vadd.f32 1.0, %v2645_v27  ;;  %v1597_v54 = vmul.f32 %v1533_v57, %v1341_v12 }
 0x327   : > { %v2647_v49 = vpop.eup %2646 }
 0x328   : > { %v1535_v58 = vadd.f32 1.0, %v2647_v49  ;;  %2009 = vmatprep.mubr.bf16.mxu1 %v1630_v6  ;;  %v1598_v5 = vmul.f32 %v1534_v13, %v1342_v43 }
 0x329   : > { %v2649_v3 = vpop.eup %2648 }
 0x32a   : > { %2010 = vmatmul.mubr.bf16.gmra.mxu1 %v1629_v18  ;;  %v1536_v24 = vadd.f32 1.0, %v2649_v3  ;;  %v1599_v26 = vmul.f32 %v1535_v58, %v1343_v10 }
 0x32c   : > { %v1600_v39 = vmul.f32 %v1536_v24, %v1344_v8  ;;  %v1631_v21 = vpack.c.bf16 %v1599_v26, %v1597_v54 }
 0x32e   : > { %v1632_v40 = vpack.c.bf16 %v1600_v39, %v1598_v5 }
 0x330   : > { %2019 = vmatprep.mubr.bf16.mxu1 %v1632_v40 }
 0x332   : > { %2020 = vmatmul.mubr.bf16.gmra.mxu1 %v1631_v21 }
 0x333   : > { %v1871_v23 = vpop.f32.mrf.mxu1 }
 0x334   : > { %v1872_v48 = vadd.f32 %v1871_v23, %v3894_v38 }
 0x335   : > { %v1873_v61 = vpop.f32.mrf.mxu1 }
 0x336   : > { %2030 = vst [vmem:[%s3903_s11] sm:$0xff] %v1872_v48  ;;  %v1874_v46 = vadd.f32 %v1873_v61, %v3898_v52 }
 0x337   : > { %v1875_v20 = vpop.f32.mrf.mxu1 }
 0x338   : > { %2031 = vst [vmem:[%s3903_s11 + $0x8] sm:$0xff] %v1874_v46  ;;  %v1876_v1 = vadd.f32 %v1875_v20, %v3894_v38 }
 0x339   : > { %v1877_v44 = vpop.f32.mrf.mxu1 }
 0x33a   : > { %2032 = vst [vmem:[%s3903_s11 + $0x10] sm:$0xff] %v1876_v1  ;;  %v1878_v14 = vadd.f32 %v1877_v44, %v3898_v52 }
 0x33b   : > { %v1881_v22 = vpop.f32.mrf.mxu1 }
 0x33c   : > { %2033 = vst [vmem:[%s3903_s11 + $0x18] sm:$0xff] %v1878_v14  ;;  %v1882_v36 = vadd.f32 %v1881_v22, %v3894_v38 }
 0x33d   : > { %v1883_v59 = vpop.f32.mrf.mxu1 }
 0x33e   : > { %2034 = vst [vmem:[%s3903_s11 + $0x20] sm:$0xff] %v1882_v36  ;;  %v1884_v41 = vadd.f32 %v1883_v59, %v3898_v52 }
 0x33f   : > { %v1885_v29 = vpop.f32.mrf.mxu1 }
 0x340   : > { %2035 = vst [vmem:[%s3903_s11 + $0x28] sm:$0xff] %v1884_v41  ;;  %v1886_v34 = vadd.f32 %v1885_v29, %v3894_v38 }
 0x341   : > { %v1887_v37 = vpop.f32.mrf.mxu1 }
 0x342   : > { %2036 = vst [vmem:[%s3903_s11 + $0x30] sm:$0xff] %v1886_v34  ;;  %v1888_v55 = vadd.f32 %v1887_v37, %v3898_v52 }
 0x343   : > { %v1891_v53 = vpop.f32.mrf.mxu1 }
 0x344   : > { %2037 = vst [vmem:[%s3903_s11 + $0x38] sm:$0xff] %v1888_v55  ;;  %v1892_v7 = vadd.f32 %v1891_v53, %v3894_v38 }
 0x345   : > { %v1893_v19 = vpop.f32.mrf.mxu1 }
 0x346   : > { %2038 = vst [vmem:[%s3903_s11 + $0x40] sm:$0xff] %v1892_v7  ;;  %v1894_v35 = vadd.f32 %v1893_v19, %v3898_v52 }
 0x347   : > { %v1895_v62 = vpop.f32.mrf.mxu1 }
 0x348   : > { %2039 = vst [vmem:[%s3903_s11 + $0x48] sm:$0xff] %v1894_v35  ;;  %v1896_v56 = vadd.f32 %v1895_v62, %v3894_v38 }
 0x349   : > { %v1897_v2 = vpop.f32.mrf.mxu1 }
 0x34a   : > { %2040 = vst [vmem:[%s3903_s11 + $0x50] sm:$0xff] %v1896_v56  ;;  %v1898_v60 = vadd.f32 %v1897_v2, %v3898_v52 }
 0x34b   : > { %v1901_v25 = vpop.f32.mrf.mxu1 }
 0x34c   : > { %2041 = vst [vmem:[%s3903_s11 + $0x58] sm:$0xff] %v1898_v60  ;;  %v1902_v17 = vadd.f32 %v1901_v25, %v3894_v38 }
 0x34d   : > { %v1903_v0 = vpop.f32.mrf.mxu1 }
 0x34e   : > { %2042 = vst [vmem:[%s3903_s11 + $0x60] sm:$0xff] %v1902_v17  ;;  %v1904_v16 = vadd.f32 %v1903_v0, %v3898_v52 }
 0x34f   : > { %v1905_v47 = vpop.f32.mrf.mxu1 }
 0x350   : > { %2043 = vst [vmem:[%s3903_s11 + $0x68] sm:$0xff] %v1904_v16  ;;  %v1906_v63 = vadd.f32 %v1905_v47, %v3894_v38 }
 0x351   : > { %v1907_v31 = vpop.f32.mrf.mxu1 }
 0x352   : > { %2044 = vst [vmem:[%s3903_s11 + $0x70] sm:$0xff] %v1906_v63  ;;  %v1908_v45 = vadd.f32 %v1907_v31, %v3898_v52 }
 0x353   : > { %v1911_v50 = vpop.f32.mrf.mxu1 }
 0x354   : > { %2045 = vst [vmem:[%s3903_s11 + $0x78] sm:$0xff] %v1908_v45  ;;  %v1912_v15 = vadd.f32 %v1911_v50, %v3894_v38 }
 0x355   : > { %v1913_v30 = vpop.f32.mrf.mxu1 }
 0x356   : > { %2046 = vst [vmem:[%s3903_s11 + $0x80] sm:$0xff] %v1912_v15  ;;  %v1914_v11 = vadd.f32 %v1913_v30, %v3898_v52 }
 0x357   : > { %v1915_v4 = vpop.f32.mrf.mxu1 }
 0x358   : > { %2047 = vst [vmem:[%s3903_s11 + $0x88] sm:$0xff] %v1914_v11  ;;  %v1916_v51 = vadd.f32 %v1915_v4, %v3894_v38 }
 0x359   : > { %v1917_v32 = vpop.f32.mrf.mxu1 }
 0x35a   : > { %2048 = vst [vmem:[%s3903_s11 + $0x90] sm:$0xff] %v1916_v51  ;;  %v1918_v9 = vadd.f32 %v1917_v32, %v3898_v52 }
 0x35b   : > { %v1921_v28 = vpop.f32.mrf.mxu1 }
 0x35c   : > { %2049 = vst [vmem:[%s3903_s11 + $0x98] sm:$0xff] %v1918_v9  ;;  %v1922_v27 = vadd.f32 %v1921_v28, %v3894_v38 }
 0x35d   : > { %v1923_v33 = vpop.f32.mrf.mxu1 }
 0x35e   : > { %2050 = vst [vmem:[%s3903_s11 + $0xa0] sm:$0xff] %v1922_v27  ;;  %v1924_v6 = vadd.f32 %v1923_v33, %v3898_v52 }
 0x35f   : > { %v1925_v49 = vpop.f32.mrf.mxu1 }
 0x360   : > { %2051 = vst [vmem:[%s3903_s11 + $0xa8] sm:$0xff] %v1924_v6  ;;  %v1926_v58 = vadd.f32 %v1925_v49, %v3894_v38 }
 0x361   : > { %v1927_v18 = vpop.f32.mrf.mxu1 }
 0x362   : > { %2052 = vst [vmem:[%s3903_s11 + $0xb0] sm:$0xff] %v1926_v58  ;;  %v1928_v13 = vadd.f32 %v1927_v18, %v3898_v52 }
 0x363   : > { %v1931_v3 = vpop.f32.mrf.mxu1 }
 0x364   : > { %2053 = vst [vmem:[%s3903_s11 + $0xb8] sm:$0xff] %v1928_v13  ;;  %v1932_v57 = vadd.f32 %v1931_v3, %v3894_v38 }
 0x365   : > { %v1933_v10 = vpop.f32.mrf.mxu1 }
 0x366   : > { %2054 = vst [vmem:[%s3903_s11 + $0xc0] sm:$0xff] %v1932_v57  ;;  %v1934_v43 = vadd.f32 %v1933_v10, %v3898_v52 }
 0x367   : > { %v1935_v8 = vpop.f32.mrf.mxu1 }
 0x368   : > { %2055 = vst [vmem:[%s3903_s11 + $0xc8] sm:$0xff] %v1934_v43  ;;  %v1936_v24 = vadd.f32 %v1935_v8, %v3894_v38 }
 0x369   : > { %v1937_v12 = vpop.f32.mrf.mxu1 }
 0x36a   : > { %2056 = vst [vmem:[%s3903_s11 + $0xd0] sm:$0xff] %v1936_v24  ;;  %v1938_v26 = vadd.f32 %v1937_v12, %v3898_v52 }
 0x36b   : > { %v1941_v5 = vpop.f32.mrf.mxu1 }
 0x36c   : > { %2057 = vst [vmem:[%s3903_s11 + $0xd8] sm:$0xff] %v1938_v26  ;;  %v1942_v39 = vadd.f32 %v1941_v5, %v3894_v38 }
 0x36d   : > { %v1943_v42 = vpop.f32.mrf.mxu1 }
 0x36e   : > { %2058 = vst [vmem:[%s3903_s11 + $0xe0] sm:$0xff] %v1942_v39  ;;  %v1944_v54 = vadd.f32 %v1943_v42, %v3898_v52 }
 0x36f   : > { %v1945_v40 = vpop.f32.mrf.mxu1 }
 0x370   : > { %2059 = vst [vmem:[%s3903_s11 + $0xe8] sm:$0xff] %v1944_v54  ;;  %v1946_v21 = vadd.f32 %v1945_v40, %v3894_v38 }
 0x371   : > { %v1947_v23 = vpop.f32.mrf.mxu1 }
 0x372   : > { %2060 = vst [vmem:[%s3903_s11 + $0xf0] sm:$0xff] %v1946_v21  ;;  %v1948_v48 = vadd.f32 %v1947_v23, %v3898_v52 }
 0x373   : > { %v1951_v61 = vpop.f32.mrf.mxu1 }
 0x374   : > { %2061 = vst [vmem:[%s3903_s11 + $0xf8] sm:$0xff] %v1948_v48  ;;  %v1952_v46 = vadd.f32 %v1951_v61, %v3894_v38 }
 0x375   : > { %v1953_v20 = vpop.f32.mrf.mxu1 }
 0x376   : > { %2062 = vst [vmem:[%s3903_s11 + $0x100] sm:$0xff] %v1952_v46  ;;  %v1954_v1 = vadd.f32 %v1953_v20, %v3898_v52 }
 0x377   : > { %v1955_v44 = vpop.f32.mrf.mxu1 }
 0x378   : > { %2063 = vst [vmem:[%s3903_s11 + $0x108] sm:$0xff] %v1954_v1  ;;  %v1956_v14 = vadd.f32 %v1955_v44, %v3894_v38 }
 0x379   : > { %v1957_v22 = vpop.f32.mrf.mxu1 }
 0x37a   : > { %2064 = vst [vmem:[%s3903_s11 + $0x110] sm:$0xff] %v1956_v14  ;;  %v1958_v36 = vadd.f32 %v1957_v22, %v3898_v52 }
 0x37b   : > { %v1961_v59 = vpop.f32.mrf.mxu1 }
 0x37c   : > { %2065 = vst [vmem:[%s3903_s11 + $0x118] sm:$0xff] %v1958_v36  ;;  %v1962_v41 = vadd.f32 %v1961_v59, %v3894_v38 }
 0x37d   : > { %v1963_v29 = vpop.f32.mrf.mxu1 }
 0x37e   : > { %2066 = vst [vmem:[%s3903_s11 + $0x120] sm:$0xff] %v1962_v41  ;;  %v1964_v34 = vadd.f32 %v1963_v29, %v3898_v52 }
 0x37f   : > { %v1965_v37 = vpop.f32.mrf.mxu1 }
 0x380   : > { %2067 = vst [vmem:[%s3903_s11 + $0x128] sm:$0xff] %v1964_v34  ;;  %v1966_v55 = vadd.f32 %v1965_v37, %v3894_v38 }
 0x381   : > { %v1967_v53 = vpop.f32.mrf.mxu1 }
 0x382   : > { %2068 = vst [vmem:[%s3903_s11 + $0x130] sm:$0xff] %v1966_v55  ;;  %v1968_v7 = vadd.f32 %v1967_v53, %v3898_v52 }
 0x384   : > { %2069 = vst [vmem:[%s3903_s11 + $0x138] sm:$0xff] %v1968_v7 }
 0x3c9   : > { %v1971_v19 = vpop.f32.mrf.mxu1 }
 0x3ca   : > { %v1972_v35 = vadd.f32 %v1971_v19, %v3894_v38 }
 0x3cb   : > { %v1973_v62 = vpop.f32.mrf.mxu1 }
 0x3cc   : > { %2070 = vst [vmem:[%s3903_s11 + $0x140] sm:$0xff] %v1972_v35  ;;  %v1974_v56 = vadd.f32 %v1973_v62, %v3898_v52 }
 0x3cd   : > { %v1975_v2 = vpop.f32.mrf.mxu1 }
 0x3ce   : > { %2071 = vst [vmem:[%s3903_s11 + $0x148] sm:$0xff] %v1974_v56  ;;  %v1976_v60 = vadd.f32 %v1975_v2, %v3894_v38 }
 0x3cf   : > { %v1977_v25 = vpop.f32.mrf.mxu1 }
 0x3d0   : > { %2072 = vst [vmem:[%s3903_s11 + $0x150] sm:$0xff] %v1976_v60  ;;  %v1978_v17 = vadd.f32 %v1977_v25, %v3898_v52 }
 0x3d1   : > { %v1981_v0 = vpop.f32.mrf.mxu1 }
 0x3d2   : > { %2073 = vst [vmem:[%s3903_s11 + $0x158] sm:$0xff] %v1978_v17  ;;  %v1982_v16 = vadd.f32 %v1981_v0, %v3894_v38 }
 0x3d3   : > { %v1983_v47 = vpop.f32.mrf.mxu1 }
 0x3d4   : > { %2074 = vst [vmem:[%s3903_s11 + $0x160] sm:$0xff] %v1982_v16  ;;  %v1984_v63 = vadd.f32 %v1983_v47, %v3898_v52 }
 0x3d5   : > { %v1985_v31 = vpop.f32.mrf.mxu1 }
 0x3d6   : > { %2075 = vst [vmem:[%s3903_s11 + $0x168] sm:$0xff] %v1984_v63  ;;  %v1986_v45 = vadd.f32 %v1985_v31, %v3894_v38 }
 0x3d7   : > { %v1987_v50 = vpop.f32.mrf.mxu1 }
 0x3d8   : > { %2076 = vst [vmem:[%s3903_s11 + $0x170] sm:$0xff] %v1986_v45  ;;  %v1988_v15 = vadd.f32 %v1987_v50, %v3898_v52 }
 0x3da   : > { %v1991_v30 = vpop.f32.mrf.mxu1  ;;  %2077 = vst [vmem:[%s3903_s11 + $0x178] sm:$0xff] %v1988_v15 }
 0x3db   : > { %v1992_v11 = vadd.f32 %v1991_v30, %v3894_v38 }
 0x3dc   : > { %v1993_v4 = vpop.f32.mrf.mxu1 }
 0x3dd   : > { %2078 = vst [vmem:[%s3903_s11 + $0x180] sm:$0xff] %v1992_v11  ;;  %v1994_v51 = vadd.f32 %v1993_v4, %v3898_v52 }
 0x3de   : > { %v1995_v32 = vpop.f32.mrf.mxu1 }
 0x3df   : > { %2079 = vst [vmem:[%s3903_s11 + $0x188] sm:$0xff] %v1994_v51  ;;  %v1996_v9 = vadd.f32 %v1995_v32, %v3894_v38 }
 0x3e0   : > { %v1997_v28 = vpop.f32.mrf.mxu1 }
 0x3e1   : > { %2080 = vst [vmem:[%s3903_s11 + $0x190] sm:$0xff] %v1996_v9  ;;  %v1998_v27 = vadd.f32 %v1997_v28, %v3898_v52 }
 0x3e2   : > { %v2001_v33 = vpop.f32.mrf.mxu1 }
 0x3e3   : > { %2081 = vst [vmem:[%s3903_s11 + $0x198] sm:$0xff] %v1998_v27  ;;  %v2002_v6 = vadd.f32 %v2001_v33, %v3894_v38 }
 0x3e4   : > { %v2003_v49 = vpop.f32.mrf.mxu1 }
 0x3e5   : > { %2082 = vst [vmem:[%s3903_s11 + $0x1a0] sm:$0xff] %v2002_v6  ;;  %v2004_v58 = vadd.f32 %v2003_v49, %v3898_v52 }
 0x3e6   : > { %v2005_v18 = vpop.f32.mrf.mxu1 }
 0x3e7   : > { %2083 = vst [vmem:[%s3903_s11 + $0x1a8] sm:$0xff] %v2004_v58  ;;  %v2006_v13 = vadd.f32 %v2005_v18, %v3894_v38 }
 0x3e8   : > { %v2007_v3 = vpop.f32.mrf.mxu1 }
 0x3e9   : > { %2084 = vst [vmem:[%s3903_s11 + $0x1b0] sm:$0xff] %v2006_v13  ;;  %v2008_v57 = vadd.f32 %v2007_v3, %v3898_v52 }
 0x3ea   : > { %v2011_v10 = vpop.f32.mrf.mxu1 }
 0x3eb   : > { %2085 = vst [vmem:[%s3903_s11 + $0x1b8] sm:$0xff] %v2008_v57  ;;  %v2012_v43 = vadd.f32 %v2011_v10, %v3894_v38 }
 0x3ec   : > { %v2013_v8 = vpop.f32.mrf.mxu1 }
 0x3ed   : > { %2086 = vst [vmem:[%s3903_s11 + $0x1c0] sm:$0xff] %v2012_v43  ;;  %v2014_v24 = vadd.f32 %v2013_v8, %v3898_v52 }
 0x3ee   : > { %v2015_v12 = vpop.f32.mrf.mxu1 }
 0x3ef   : > { %2087 = vst [vmem:[%s3903_s11 + $0x1c8] sm:$0xff] %v2014_v24  ;;  %v2016_v26 = vadd.f32 %v2015_v12, %v3894_v38 }
 0x3f0   : > { %v2017_v5 = vpop.f32.mrf.mxu1 }
 0x3f1   : > { %2088 = vst [vmem:[%s3903_s11 + $0x1d0] sm:$0xff] %v2016_v26  ;;  %v2018_v39 = vadd.f32 %v2017_v5, %v3898_v52 }
 0x3f2   : > { %v2021_v42 = vpop.f32.mrf.mxu1 }
 0x3f3   : > { %2089 = vst [vmem:[%s3903_s11 + $0x1d8] sm:$0xff] %v2018_v39  ;;  %v2022_v54 = vadd.f32 %v2021_v42, %v3894_v38 }
 0x3f4   : > { %v2023_v40 = vpop.f32.mrf.mxu1 }
 0x3f5   : > { %2090 = vst [vmem:[%s3903_s11 + $0x1e0] sm:$0xff] %v2022_v54  ;;  %v2024_v21 = vadd.f32 %v2023_v40, %v3898_v52 }
 0x3f6   : > { %v2025_v23 = vpop.f32.mrf.mxu1 }
 0x3f7   : > { %2091 = vst [vmem:[%s3903_s11 + $0x1e8] sm:$0xff] %v2024_v21  ;;  %v2026_v48 = vadd.f32 %v2025_v23, %v3894_v38 }
 0x3f8   : > { %v2027_v61 = vpop.f32.mrf.mxu1 }
 0x3f9   : > { %2092 = vst [vmem:[%s3903_s11 + $0x1f0] sm:$0xff] %v2026_v48  ;;  %v2028_v46 = vadd.f32 %v2027_v61, %v3898_v52 }
 0x3fb   : > { %2093 = vst [vmem:[%s3903_s11 + $0x1f8] sm:$0xff] %v2028_v46 }
 0x3fc   : > { %2743 = shalt.err (!%p2740_p9)
}
 0x3fd   : > { %s2744_s30 = scalar_lea.hbm %s4034_s9, 8192  ;;  %s2748_s8 = scalar_lea.hbm %s4086_s5, 24576 }
 0x3fe   : > { %p2745_p12 = scmp.ne.s32.totalorder %s4034_s9, %s2744_s30  ;;  %p2749_p4 = scmp.lt.s32.totalorder %s4034_s9, %s4086_s5 }
 0x3ff   : > { %p2750_p8 = scmp.lt.s32.totalorder %s2748_s8, %s2744_s30 }
 0x400   : > { %p2746_p3 = pnand %p2745_p12, %p4159_p0 }
 0x401   : > { %p2751_p5 = por %p2750_p8, %p2749_p4 }
 0x402   : > { %p2747_p13 = pneg %p2746_p3 }
 0x404   : > { %p2752_p10 = pnand %p2751_p5, %p2747_p13 }
 0x406   : > { %2755 = shalt.err (!%p2752_p10)
}
 0x407   : > { %s2808_s12 = smov 256   ;;  %s2809_s6 = smov 16  }
 0x408   : > { %2299 = dma.vmem_to_hbm [thread:$0]  (%p4159_p0), %s4036_s28, 8192, %s4034_s9, %s2095_s22, %s2808_s12, %s2808_s12, %s2809_s6  }
 0x409 PF: > { %p2321_p1 = scmp.ge.s32.totalorder %s2798_s21, 2  ;;  %s2124_s7 = sand.u32 1, %s2786_s18  }
 0x40a   : > { %p4160_p2 = scmp.ne.s32.totalorder %s4111_s25, 0  ;;  %s2125_s13 = scalar_lea.sflag [#allocation4], %s2124_s7 }
 0x40c   : > { %p2313_p6 = pnand %p2321_p1, %p4160_p2 }
 0x40e   : > { %p2314_p11 = pneg %p2313_p6 }
 0x410   : > { %2781 = dma.done.wait (%p2314_p11), %s2125_s13, 8192  }
 0x411   : > { %2783 = vsyncadd (%p2314_p11), %s2125_s13, 4294959104  ;;  %p19_p7 = scmp.ge.s32.totalorder %s2911_s15, 5   ;;  %s4161_s18 = smov %s2790_s19 }
 0x412   : > { %s4162_s19 = smov %s2794_s20  ;;  %s4163_s20 = smov %s2927_s27 }
 0x413   : > { %s4164_s21 = smov %s2911_s15  ;;  %21 = sbr.rel (!%p19_p7) target bundleno = 6 (0x6), region = 93 }
 0x418   :  { %2130 = vsyncpa [#allocation3], 1 }
 0x419   :  { %2132 = vsyncpa [#allocation3 + $0x1], 1 }
 0x41a   :  { %2133 = vsyncpa [#allocation6], 1 }
 0x41b   :  { %2134 = vsyncpa [#allocation4], 1 }
 0x41c   :  { %2136 = vsyncpa [#allocation4 + $0x1], 1 }

</bundles_post_ra>
